<compile_context>
chip_gen: v7x
topology: tpu7x:2x2x1
jax: 0.10.0
libtpu: 0.0.40
codegen_flags: <defaults>
</compile_context>

<pallas_src>
import jax
import jax.numpy as jnp
from jax.experimental import pallas as pl
from jax.experimental.pallas import tpu as pltpu


def _bottleneck_kernel(x_ref, w1_ref, w2_ref, w3_ref, b12_ref, b3_ref,
                       o_ref, patches_ref):
    ipb, H, W, Cin = x_ref.shape
    Cmid = w1_ref.shape[1]
    Cout = w3_ref.shape[1]
    M = ipb * H * W
    mxu_dtype = w1_ref.dtype          # bf16 (or f32) for MXU operands

    # Residual copy stays in f32; cast once for the first matmul.
    x = x_ref[...].reshape(M, Cin)

    # --- conv1 (1x1, BN scale folded into w1) + bias + relu ----------------
    h1 = jnp.dot(x.astype(mxu_dtype), w1_ref[...],
                 preferred_element_type=jnp.float32)
    h1 = jnp.maximum(h1 + b12_ref[0:1, :], 0.0)
    # Single (M, Cmid) cast; everything scattered below is already MXU dtype.
    h1_img = h1.astype(mxu_dtype).reshape(ipb, H, W, Cmid)

    # --- conv2 (3x3, stride 1, pad 1) as ONE big-K matmul ------------------
    # Build the im2col matrix directly inside a VMEM scratch: each of the 9
    # taps is written into its own Cmid-wide lane band.  Only the padding
    # strips of each band are zeroed (instead of a full-scratch memset); every
    # position of every band is rewritten each grid step, so the kernel stays
    # correct when the "parallel" grid axis is sharded across TensorCores.
    zero_band = jnp.zeros((ipb, H, W, Cmid), patches_ref.dtype)  # hoisted
    for kh in range(3):
        oh = kh - 1
        dh_lo, dh_hi = max(0, -oh), H - max(0, oh)      # dst rows (output h)
        sh_lo, sh_hi = max(0, oh), H - max(0, -oh)      # src rows (input h)
        for kw in range(3):
            ow = kw - 1
            dw_lo, dw_hi = max(0, -ow), W - max(0, ow)
            sw_lo, sw_hi = max(0, ow), W - max(0, -ow)
            c0 = (kh * 3 + kw) * Cmid
            band = slice(c0, c0 + Cmid)
            patches_ref[:, dh_lo:dh_hi, dw_lo:dw_hi, band] = (
                h1_img[:, sh_lo:sh_hi, sw_lo:sw_hi, :])
            # Zero only this tap's padding strips (static Python conditions).
            if dh_lo > 0:
                patches_ref[:, :dh_lo, :, band] = zero_band[:, :dh_lo, :, :]
            if dh_hi < H:
                patches_ref[:, dh_hi:, :, band] = zero_band[:, dh_hi:, :, :]
            if dw_lo > 0:
                patches_ref[:, dh_lo:dh_hi, :dw_lo, band] = (
                    zero_band[:, dh_lo:dh_hi, :dw_lo, :])
            if dw_hi < W:
                patches_ref[:, dh_lo:dh_hi, dw_hi:, band] = (
                    zero_band[:, dh_lo:dh_hi, dw_hi:, :])

    patch_mat = patches_ref[...].reshape(M, 9 * Cmid)     # already MXU dtype
    h2 = jnp.dot(patch_mat, w2_ref[...], preferred_element_type=jnp.float32)
    h2 = jnp.maximum(h2 + b12_ref[1:2, :], 0.0)

    # --- conv3 (1x1, BN scale folded into w3) + bias + residual + relu -----
    h3 = jnp.dot(h2.astype(mxu_dtype), w3_ref[...],
                 preferred_element_type=jnp.float32)
    out = jnp.maximum(h3 + b3_ref[...] + x, 0.0)

    o_ref[...] = out.reshape(ipb, H, W, Cout)


def bottleneck_forward(x_nhwc, params, *, mxu_dtype=jnp.bfloat16,
                       images_per_step=None):
    """x_nhwc: (N, H, W, Cin) float32; params: raw conv weights + BN scale/bias."""
    N, H, W, Cin = x_nhwc.shape
    w1, w2, w3 = params["w1"], params["w2"], params["w3"]
    Cmid = w1.shape[1]
    Cout = w3.shape[1]
    assert Cout == Cin, "downsample=None requires in_planes == 4*out_planes"

    # Fold eval-mode BN scale into the conv weights (output-channel axis).
    # Only biases survive into the kernel; weights go in at MXU dtype.
    w1f = (w1 * params["s1"][None, :]).astype(mxu_dtype)
    w2f = (w2 * params["s2"][None, None, None, :]
           ).reshape(9 * Cmid, Cmid).astype(mxu_dtype)       # rows = (kh,kw,cin)
    w3f = (w3 * params["s3"][None, :]).astype(mxu_dtype)
    b12 = jnp.stack([params["b1"], params["b2"]], axis=0).astype(jnp.float32)
    b3 = params["b3"].reshape(1, Cout).astype(jnp.float32)

    if images_per_step is None:
        # Largest divisor of N keeping M = ipb*H*W <= 1024 rows per step:
        # bigger M per MXU call, fewer grid steps (per-step overhead ~0.35us).
        images_per_step = 1
        for d in range(1, N + 1):
            if N % d == 0 and d * H * W <= 1024:
                images_per_step = d
    ipb = images_per_step
    assert N % ipb == 0
    grid = (N // ipb,)

    in_specs = [
        pl.BlockSpec((ipb, H, W, Cin), lambda n: (n, 0, 0, 0)),   # x
        pl.BlockSpec((Cin, Cmid), lambda n: (0, 0)),              # w1 (folded)
        pl.BlockSpec((9 * Cmid, Cmid), lambda n: (0, 0)),         # w2 (folded, im2col layout)
        pl.BlockSpec((Cmid, Cout), lambda n: (0, 0)),             # w3 (folded)
        pl.BlockSpec((2, Cmid), lambda n: (0, 0)),                # b1/b2 packed
        pl.BlockSpec((1, Cout), lambda n: (0, 0)),                # b3
    ]
    out_specs = pl.BlockSpec((ipb, H, W, Cout), lambda n: (n, 0, 0, 0))

    return pl.pallas_call(
        _bottleneck_kernel,
        out_shape=jax.ShapeDtypeStruct((N, H, W, Cout), jnp.float32),
        grid=grid,
        in_specs=in_specs,
        out_specs=out_specs,
        scratch_shapes=[pltpu.VMEM((ipb, H, W, 9 * Cmid), mxu_dtype)],
        compiler_params=pltpu.CompilerParams(
            dimension_semantics=("parallel",),
            vmem_limit_bytes=32 * 1024 * 1024),
    )(x_nhwc, w1f, w2f, w3f, b12, b3)


def _reference_forward(x_nhwc, params):
    """Pure-JAX reference (lax convs, unfused BN) for correctness checking."""
    def conv(x, w, stride=1):
        return jax.lax.conv_general_dilated(
            x, w, (stride, stride), "SAME",
            dimension_numbers=("NHWC", "HWIO", "NHWC"))

    Cin = x_nhwc.shape[-1]
    Cmid = params["w1"].shape[1]
    Cout = params["w3"].shape[1]

    h = conv(x_nhwc, params["w1"].reshape(1, 1, Cin, Cmid))
    h = jnp.maximum(h * params["s1"] + params["b1"], 0.0)
    h = conv(h, params["w2"])
    h = jnp.maximum(h * params["s2"] + params["b2"], 0.0)
    h = conv(h, params["w3"].reshape(1, 1, Cmid, Cout))
    h = h * params["s3"] + params["b3"]
    return jnp.maximum(h + x_nhwc, 0.0)


def _make_params(key, in_planes, out_planes, eps=1e-5):
    """Deterministic synthetic weights + eval-mode BatchNorm folded to scale/bias."""
    ks = jax.random.split(key, 12)
    Cin, Cmid, Cout = in_planes, out_planes, out_planes * 4

    def bn(kg, kb, km, kv, c):
        gamma = 1.0 + 0.1 * jax.random.normal(kg, (c,), jnp.float32)
        beta = 0.1 * jax.random.normal(kb, (c,), jnp.float32)
        mean = 0.1 * jax.random.normal(km, (c,), jnp.float32)
        var = jax.nn.softplus(jax.random.normal(kv, (c,), jnp.float32)) + 0.5
        scale = gamma / jnp.sqrt(var + eps)
        bias = beta - mean * scale
        return scale, bias

    w1 = 0.2 * jax.random.normal(ks[0], (Cin, Cmid), jnp.float32)
    w2 = 0.2 * jax.random.normal(ks[1], (3, 3, Cmid, Cmid), jnp.float32)
    w3 = 0.2 * jax.random.normal(ks[2], (Cmid, Cout), jnp.float32)
    s1, b1 = bn(ks[3], ks[4], ks[5], ks[6], Cmid)
    s2, b2 = bn(ks[7], ks[8], ks[9], ks[10], Cmid)
    k3 = jax.random.split(ks[11], 4)
    s3, b3 = bn(k3[0], k3[1], k3[2], k3[3], Cout)
    return dict(w1=w1, w2=w2, w3=w3, s1=s1, b1=b1, s2=s2, b2=b2, s3=s3, b3=b3)


if __name__ == "__main__":
    # Bottleneck(in_planes=16, out_planes=4, stride=1, downsample=None)
    N, Cin, H, W = 2, 16, 8, 8
    out_planes = 4

    key = jax.random.PRNGKey(0)
    kx, kp = jax.random.split(key)
    x_nchw = jax.random.normal(kx, (N, Cin, H, W), jnp.float32)   # PyTorch layout
    x_nhwc = jnp.transpose(x_nchw, (0, 2, 3, 1))                  # kernel layout

    params = _make_params(kp, Cin, out_planes)
    ref = _reference_forward(x_nhwc, params)

    # 1) f32 MXU path: tight check against the unfused reference.
    out_f32 = jax.block_until_ready(
        bottleneck_forward(x_nhwc, params, mxu_dtype=jnp.float32))
    assert out_f32.shape == (N, H, W, Cin)
    assert jnp.allclose(out_f32, ref, atol=1e-4, rtol=1e-4), "f32 path mismatch"

    # 2) bf16 MXU operands (f32 accumulation + f32 epilogue): loose tolerance.
    out_bf16 = jax.block_until_ready(
        bottleneck_forward(x_nhwc, params, mxu_dtype=jnp.bfloat16))
    assert out_bf16.shape == (N, H, W, Cin)
    assert jnp.allclose(out_bf16, ref, atol=5e-2, rtol=5e-2), "bf16 path mismatch"

    print("KERNEL_OK")
</pallas_src>

<mosaic_0001>
module attributes {stable_mosaic.version = 11 : i64} {
  func.func @_bottleneck_kernel(%arg0: i32, %arg1: memref<2x8x8x16xf32, #tpu.memory_space<vmem>>, %arg2: memref<16x4xf32, #tpu.memory_space<vmem>>, %arg3: memref<36x4xf32, #tpu.memory_space<vmem>>, %arg4: memref<4x16xf32, #tpu.memory_space<vmem>>, %arg5: memref<2x4xf32, #tpu.memory_space<vmem>>, %arg6: memref<1x16xf32, #tpu.memory_space<vmem>>, %arg7: memref<2x8x8x16xf32, #tpu.memory_space<vmem>>, %arg8: memref<2x8x8x36xf32, #tpu.memory_space<vmem>>) attributes {dimension_semantics = [#tpu.dimension_semantics<parallel>], iteration_bounds = array<i64: 1>, scalar_prefetch = 0 : i64, scratch_operands = 1 : i64, tpu.core_type = #tpu.core_type<tc>, window_params = [{transform_indices = @transform_0, window_bounds = array<i64: 2, 8, 8, 16>}, {pipeline_mode = #tpu.pipeline_mode<synchronous>, transform_indices = @transform_1, window_bounds = array<i64: 16, 4>}, {pipeline_mode = #tpu.pipeline_mode<synchronous>, transform_indices = @transform_2, window_bounds = array<i64: 36, 4>}, {pipeline_mode = #tpu.pipeline_mode<synchronous>, transform_indices = @transform_3, window_bounds = array<i64: 4, 16>}, {pipeline_mode = #tpu.pipeline_mode<synchronous>, transform_indices = @transform_4, window_bounds = array<i64: 2, 4>}, {pipeline_mode = #tpu.pipeline_mode<synchronous>, transform_indices = @transform_5, window_bounds = array<i64: 1, 16>}, {transform_indices = @transform_6, window_bounds = array<i64: 2, 8, 8, 16>}]} {
    %c0 = arith.constant 0 : index
    %c0_0 = arith.constant 0 : index
    %c0_1 = arith.constant 0 : index
    %c0_2 = arith.constant 0 : index
    %0 = vector.load %arg1[%c0, %c0_0, %c0_1, %c0_2] : memref<2x8x8x16xf32, #tpu.memory_space<vmem>>, vector<2x8x8x16xf32>
    %1 = vector.shape_cast %0 : vector<2x8x8x16xf32> to vector<128x16xf32>
    %c0_3 = arith.constant 0 : index
    %c0_4 = arith.constant 0 : index
    %2 = vector.load %arg2[%c0_3, %c0_4] : memref<16x4xf32, #tpu.memory_space<vmem>>, vector<16x4xf32>
    %cst = arith.constant dense<0.000000e+00> : vector<128x4xf32>
    %3 = tpu.matmul %1, %2, %cst {dimension_numbers = #tpu.dot_dimension_numbers<[1], [0], [0], [1], [0, 0, 1, 1], [], []>} : vector<128x16xf32>, vector<16x4xf32>, vector<128x4xf32> -> vector<128x4xf32>
    %c0_5 = arith.constant 0 : index
    %c0_6 = arith.constant 0 : index
    %4 = vector.load %arg5[%c0_5, %c0_6] : memref<2x4xf32, #tpu.memory_space<vmem>>, vector<1x4xf32>
    %5 = vector.broadcast %4 : vector<1x4xf32> to vector<128x4xf32>
    %6 = arith.addf %3, %5 : vector<128x4xf32>
    %cst_7 = arith.constant 0.000000e+00 : f32
    %7 = vector.broadcast %cst_7 : f32 to vector<128x4xf32>
    %8 = arith.maximumf %6, %7 : vector<128x4xf32>
    %9 = vector.shape_cast %8 : vector<128x4xf32> to vector<2x8x8x4xf32>
    %cst_8 = arith.constant 0.000000e+00 : f32
    %10 = vector.broadcast %cst_8 : f32 to vector<2x8x8x4xf32>
    %11 = vector.extract_strided_slice %9 {offsets = [0, 0, 0, 0], sizes = [2, 7, 7, 4], strides = [1, 1, 1, 1]} : vector<2x8x8x4xf32> to vector<2x7x7x4xf32>
    %c0_9 = arith.constant 0 : index
    %c1 = arith.constant 1 : index
    %c1_10 = arith.constant 1 : index
    %c0_11 = arith.constant 0 : index
    %12 = vector.load %arg8[%c0_9, %c1, %c1_10, %c0_11] : memref<2x8x8x36xf32, #tpu.memory_space<vmem>>, vector<2x7x7x4xf32>
    tpu.vector_store %arg8[%c0_9, %c1, %c1_10, %c0_11], %11 {strides = array<i32>} : memref<2x8x8x36xf32, #tpu.memory_space<vmem>>, vector<2x7x7x4xf32>,
    %13 = vector.extract_strided_slice %10 {offsets = [0, 0, 0, 0], sizes = [2, 1, 8, 4], strides = [1, 1, 1, 1]} : vector<2x8x8x4xf32> to vector<2x1x8x4xf32>
    %c0_12 = arith.constant 0 : index
    %c0_13 = arith.constant 0 : index
    %c0_14 = arith.constant 0 : index
    %c0_15 = arith.constant 0 : index
    %14 = vector.load %arg8[%c0_12, %c0_13, %c0_14, %c0_15] : memref<2x8x8x36xf32, #tpu.memory_space<vmem>>, vector<2x1x8x4xf32>
    tpu.vector_store %arg8[%c0_12, %c0_13, %c0_14, %c0_15], %13 {strides = array<i32>} : memref<2x8x8x36xf32, #tpu.memory_space<vmem>>, vector<2x1x8x4xf32>,
    %15 = vector.extract_strided_slice %10 {offsets = [0, 1, 0, 0], sizes = [2, 7, 1, 4], strides = [1, 1, 1, 1]} : vector<2x8x8x4xf32> to vector<2x7x1x4xf32>
    %c0_16 = arith.constant 0 : index
    %c1_17 = arith.constant 1 : index
    %c0_18 = arith.constant 0 : index
    %c0_19 = arith.constant 0 : index
    %16 = vector.load %arg8[%c0_16, %c1_17, %c0_18, %c0_19] : memref<2x8x8x36xf32, #tpu.memory_space<vmem>>, vector<2x7x1x4xf32>
    tpu.vector_store %arg8[%c0_16, %c1_17, %c0_18, %c0_19], %15 {strides = array<i32>} : memref<2x8x8x36xf32, #tpu.memory_space<vmem>>, vector<2x7x1x4xf32>,
    %17 = vector.extract_strided_slice %9 {offsets = [0, 0, 0, 0], sizes = [2, 7, 8, 4], strides = [1, 1, 1, 1]} : vector<2x8x8x4xf32> to vector<2x7x8x4xf32>
    %c0_20 = arith.constant 0 : index
    %c1_21 = arith.constant 1 : index
    %c0_22 = arith.constant 0 : index
    %c4 = arith.constant 4 : index
    %18 = vector.load %arg8[%c0_20, %c1_21, %c0_22, %c4] : memref<2x8x8x36xf32, #tpu.memory_space<vmem>>, vector<2x7x8x4xf32>
    tpu.vector_store %arg8[%c0_20, %c1_21, %c0_22, %c4], %17 {strides = array<i32>} : memref<2x8x8x36xf32, #tpu.memory_space<vmem>>, vector<2x7x8x4xf32>,
    %19 = vector.extract_strided_slice %10 {offsets = [0, 0, 0, 0], sizes = [2, 1, 8, 4], strides = [1, 1, 1, 1]} : vector<2x8x8x4xf32> to vector<2x1x8x4xf32>
    %c0_23 = arith.constant 0 : index
    %c0_24 = arith.constant 0 : index
    %c0_25 = arith.constant 0 : index
    %c4_26 = arith.constant 4 : index
    %20 = vector.load %arg8[%c0_23, %c0_24, %c0_25, %c4_26] : memref<2x8x8x36xf32, #tpu.memory_space<vmem>>, vector<2x1x8x4xf32>
    tpu.vector_store %arg8[%c0_23, %c0_24, %c0_25, %c4_26], %19 {strides = array<i32>} : memref<2x8x8x36xf32, #tpu.memory_space<vmem>>, vector<2x1x8x4xf32>,
    %21 = vector.extract_strided_slice %9 {offsets = [0, 0, 1, 0], sizes = [2, 7, 7, 4], strides = [1, 1, 1, 1]} : vector<2x8x8x4xf32> to vector<2x7x7x4xf32>
    %c0_27 = arith.constant 0 : index
    %c1_28 = arith.constant 1 : index
    %c0_29 = arith.constant 0 : index
    %c8 = arith.constant 8 : index
    %22 = vector.load %arg8[%c0_27, %c1_28, %c0_29, %c8] : memref<2x8x8x36xf32, #tpu.memory_space<vmem>>, vector<2x7x7x4xf32>
    tpu.vector_store %arg8[%c0_27, %c1_28, %c0_29, %c8], %21 {strides = array<i32>} : memref<2x8x8x36xf32, #tpu.memory_space<vmem>>, vector<2x7x7x4xf32>,
    %23 = vector.extract_strided_slice %10 {offsets = [0, 0, 0, 0], sizes = [2, 1, 8, 4], strides = [1, 1, 1, 1]} : vector<2x8x8x4xf32> to vector<2x1x8x4xf32>
    %c0_30 = arith.constant 0 : index
    %c0_31 = arith.constant 0 : index
    %c0_32 = arith.constant 0 : index
    %c8_33 = arith.constant 8 : index
    %24 = vector.load %arg8[%c0_30, %c0_31, %c0_32, %c8_33] : memref<2x8x8x36xf32, #tpu.memory_space<vmem>>, vector<2x1x8x4xf32>
    tpu.vector_store %arg8[%c0_30, %c0_31, %c0_32, %c8_33], %23 {strides = array<i32>} : memref<2x8x8x36xf32, #tpu.memory_space<vmem>>, vector<2x1x8x4xf32>,
    %25 = vector.extract_strided_slice %10 {offsets = [0, 1, 7, 0], sizes = [2, 7, 1, 4], strides = [1, 1, 1, 1]} : vector<2x8x8x4xf32> to vector<2x7x1x4xf32>
    %c0_34 = arith.constant 0 : index
    %c1_35 = arith.constant 1 : index
    %c7 = arith.constant 7 : index
    %c8_36 = arith.constant 8 : index
    %26 = vector.load %arg8[%c0_34, %c1_35, %c7, %c8_36] : memref<2x8x8x36xf32, #tpu.memory_space<vmem>>, vector<2x7x1x4xf32>
    tpu.vector_store %arg8[%c0_34, %c1_35, %c7, %c8_36], %25 {strides = array<i32>} : memref<2x8x8x36xf32, #tpu.memory_space<vmem>>, vector<2x7x1x4xf32>,
    %27 = vector.extract_strided_slice %9 {offsets = [0, 0, 0, 0], sizes = [2, 8, 7, 4], strides = [1, 1, 1, 1]} : vector<2x8x8x4xf32> to vector<2x8x7x4xf32>
    %c0_37 = arith.constant 0 : index
    %c0_38 = arith.constant 0 : index
    %c1_39 = arith.constant 1 : index
    %c12 = arith.constant 12 : index
    %28 = vector.load %arg8[%c0_37, %c0_38, %c1_39, %c12] : memref<2x8x8x36xf32, #tpu.memory_space<vmem>>, vector<2x8x7x4xf32>
    tpu.vector_store %arg8[%c0_37, %c0_38, %c1_39, %c12], %27 {strides = array<i32>} : memref<2x8x8x36xf32, #tpu.memory_space<vmem>>, vector<2x8x7x4xf32>,
    %29 = vector.extract_strided_slice %10 {offsets = [0, 0, 0, 0], sizes = [2, 8, 1, 4], strides = [1, 1, 1, 1]} : vector<2x8x8x4xf32> to vector<2x8x1x4xf32>
    %c0_40 = arith.constant 0 : index
    %c0_41 = arith.constant 0 : index
    %c0_42 = arith.constant 0 : index
    %c12_43 = arith.constant 12 : index
    %30 = vector.load %arg8[%c0_40, %c0_41, %c0_42, %c12_43] : memref<2x8x8x36xf32, #tpu.memory_space<vmem>>, vector<2x8x1x4xf32>
    tpu.vector_store %arg8[%c0_40, %c0_41, %c0_42, %c12_43], %29 {strides = array<i32>} : memref<2x8x8x36xf32, #tpu.memory_space<vmem>>, vector<2x8x1x4xf32>,
    %c0_44 = arith.constant 0 : index
    %c0_45 = arith.constant 0 : index
    %c0_46 = arith.constant 0 : index
    %c16 = arith.constant 16 : index
    %31 = vector.load %arg8[%c0_44, %c0_45, %c0_46, %c16] : memref<2x8x8x36xf32, #tpu.memory_space<vmem>>, vector<2x8x8x4xf32>
    tpu.vector_store %arg8[%c0_44, %c0_45, %c0_46, %c16], %9 {strides = array<i32>} : memref<2x8x8x36xf32, #tpu.memory_space<vmem>>, vector<2x8x8x4xf32>,
    %32 = vector.extract_strided_slice %9 {offsets = [0, 0, 1, 0], sizes = [2, 8, 7, 4], strides = [1, 1, 1, 1]} : vector<2x8x8x4xf32> to vector<2x8x7x4xf32>
    %c0_47 = arith.constant 0 : index
    %c0_48 = arith.constant 0 : index
    %c0_49 = arith.constant 0 : index
    %c20 = arith.constant 20 : index
    %33 = vector.load %arg8[%c0_47, %c0_48, %c0_49, %c20] : memref<2x8x8x36xf32, #tpu.memory_space<vmem>>, vector<2x8x7x4xf32>
    tpu.vector_store %arg8[%c0_47, %c0_48, %c0_49, %c20], %32 {strides = array<i32>} : memref<2x8x8x36xf32, #tpu.memory_space<vmem>>, vector<2x8x7x4xf32>,
    %34 = vector.extract_strided_slice %10 {offsets = [0, 0, 7, 0], sizes = [2, 8, 1, 4], strides = [1, 1, 1, 1]} : vector<2x8x8x4xf32> to vector<2x8x1x4xf32>
    %c0_50 = arith.constant 0 : index
    %c0_51 = arith.constant 0 : index
    %c7_52 = arith.constant 7 : index
    %c20_53 = arith.constant 20 : index
    %35 = vector.load %arg8[%c0_50, %c0_51, %c7_52, %c20_53] : memref<2x8x8x36xf32, #tpu.memory_space<vmem>>, vector<2x8x1x4xf32>
    tpu.vector_store %arg8[%c0_50, %c0_51, %c7_52, %c20_53], %34 {strides = array<i32>} : memref<2x8x8x36xf32, #tpu.memory_space<vmem>>, vector<2x8x1x4xf32>,
    %36 = vector.extract_strided_slice %9 {offsets = [0, 1, 0, 0], sizes = [2, 7, 7, 4], strides = [1, 1, 1, 1]} : vector<2x8x8x4xf32> to vector<2x7x7x4xf32>
    %c0_54 = arith.constant 0 : index
    %c0_55 = arith.constant 0 : index
    %c1_56 = arith.constant 1 : index
    %c24 = arith.constant 24 : index
    %37 = vector.load %arg8[%c0_54, %c0_55, %c1_56, %c24] : memref<2x8x8x36xf32, #tpu.memory_space<vmem>>, vector<2x7x7x4xf32>
    tpu.vector_store %arg8[%c0_54, %c0_55, %c1_56, %c24], %36 {strides = array<i32>} : memref<2x8x8x36xf32, #tpu.memory_space<vmem>>, vector<2x7x7x4xf32>,
    %38 = vector.extract_strided_slice %10 {offsets = [0, 7, 0, 0], sizes = [2, 1, 8, 4], strides = [1, 1, 1, 1]} : vector<2x8x8x4xf32> to vector<2x1x8x4xf32>
    %c0_57 = arith.constant 0 : index
    %c7_58 = arith.constant 7 : index
    %c0_59 = arith.constant 0 : index
    %c24_60 = arith.constant 24 : index
    %39 = vector.load %arg8[%c0_57, %c7_58, %c0_59, %c24_60] : memref<2x8x8x36xf32, #tpu.memory_space<vmem>>, vector<2x1x8x4xf32>
    tpu.vector_store %arg8[%c0_57, %c7_58, %c0_59, %c24_60], %38 {strides = array<i32>} : memref<2x8x8x36xf32, #tpu.memory_space<vmem>>, vector<2x1x8x4xf32>,
    %40 = vector.extract_strided_slice %10 {offsets = [0, 0, 0, 0], sizes = [2, 7, 1, 4], strides = [1, 1, 1, 1]} : vector<2x8x8x4xf32> to vector<2x7x1x4xf32>
    %c0_61 = arith.constant 0 : index
    %c0_62 = arith.constant 0 : index
    %c0_63 = arith.constant 0 : index
    %c24_64 = arith.constant 24 : index
    %41 = vector.load %arg8[%c0_61, %c0_62, %c0_63, %c24_64] : memref<2x8x8x36xf32, #tpu.memory_space<vmem>>, vector<2x7x1x4xf32>
    tpu.vector_store %arg8[%c0_61, %c0_62, %c0_63, %c24_64], %40 {strides = array<i32>} : memref<2x8x8x36xf32, #tpu.memory_space<vmem>>, vector<2x7x1x4xf32>,
    %42 = vector.extract_strided_slice %9 {offsets = [0, 1, 0, 0], sizes = [2, 7, 8, 4], strides = [1, 1, 1, 1]} : vector<2x8x8x4xf32> to vector<2x7x8x4xf32>
    %c0_65 = arith.constant 0 : index
    %c0_66 = arith.constant 0 : index
    %c0_67 = arith.constant 0 : index
    %c28 = arith.constant 28 : index
    %43 = vector.load %arg8[%c0_65, %c0_66, %c0_67, %c28] : memref<2x8x8x36xf32, #tpu.memory_space<vmem>>, vector<2x7x8x4xf32>
    tpu.vector_store %arg8[%c0_65, %c0_66, %c0_67, %c28], %42 {strides = array<i32>} : memref<2x8x8x36xf32, #tpu.memory_space<vmem>>, vector<2x7x8x4xf32>,
    %44 = vector.extract_strided_slice %10 {offsets = [0, 7, 0, 0], sizes = [2, 1, 8, 4], strides = [1, 1, 1, 1]} : vector<2x8x8x4xf32> to vector<2x1x8x4xf32>
    %c0_68 = arith.constant 0 : index
    %c7_69 = arith.constant 7 : index
    %c0_70 = arith.constant 0 : index
    %c28_71 = arith.constant 28 : index
    %45 = vector.load %arg8[%c0_68, %c7_69, %c0_70, %c28_71] : memref<2x8x8x36xf32, #tpu.memory_space<vmem>>, vector<2x1x8x4xf32>
    tpu.vector_store %arg8[%c0_68, %c7_69, %c0_70, %c28_71], %44 {strides = array<i32>} : memref<2x8x8x36xf32, #tpu.memory_space<vmem>>, vector<2x1x8x4xf32>,
    %46 = vector.extract_strided_slice %9 {offsets = [0, 1, 1, 0], sizes = [2, 7, 7, 4], strides = [1, 1, 1, 1]} : vector<2x8x8x4xf32> to vector<2x7x7x4xf32>
    %c0_72 = arith.constant 0 : index
    %c0_73 = arith.constant 0 : index
    %c0_74 = arith.constant 0 : index
    %c32 = arith.constant 32 : index
    %47 = vector.load %arg8[%c0_72, %c0_73, %c0_74, %c32] : memref<2x8x8x36xf32, #tpu.memory_space<vmem>>, vector<2x7x7x4xf32>
    tpu.vector_store %arg8[%c0_72, %c0_73, %c0_74, %c32], %46 {strides = array<i32>} : memref<2x8x8x36xf32, #tpu.memory_space<vmem>>, vector<2x7x7x4xf32>,
    %48 = vector.extract_strided_slice %10 {offsets = [0, 7, 0, 0], sizes = [2, 1, 8, 4], strides = [1, 1, 1, 1]} : vector<2x8x8x4xf32> to vector<2x1x8x4xf32>
    %c0_75 = arith.constant 0 : index
    %c7_76 = arith.constant 7 : index
    %c0_77 = arith.constant 0 : index
    %c32_78 = arith.constant 32 : index
    %49 = vector.load %arg8[%c0_75, %c7_76, %c0_77, %c32_78] : memref<2x8x8x36xf32, #tpu.memory_space<vmem>>, vector<2x1x8x4xf32>
    tpu.vector_store %arg8[%c0_75, %c7_76, %c0_77, %c32_78], %48 {strides = array<i32>} : memref<2x8x8x36xf32, #tpu.memory_space<vmem>>, vector<2x1x8x4xf32>,
    %50 = vector.extract_strided_slice %10 {offsets = [0, 0, 7, 0], sizes = [2, 7, 1, 4], strides = [1, 1, 1, 1]} : vector<2x8x8x4xf32> to vector<2x7x1x4xf32>
    %c0_79 = arith.constant 0 : index
    %c0_80 = arith.constant 0 : index
    %c7_81 = arith.constant 7 : index
    %c32_82 = arith.constant 32 : index
    %51 = vector.load %arg8[%c0_79, %c0_80, %c7_81, %c32_82] : memref<2x8x8x36xf32, #tpu.memory_space<vmem>>, vector<2x7x1x4xf32>
    tpu.vector_store %arg8[%c0_79, %c0_80, %c7_81, %c32_82], %50 {strides = array<i32>} : memref<2x8x8x36xf32, #tpu.memory_space<vmem>>, vector<2x7x1x4xf32>,
    %c0_83 = arith.constant 0 : index
    %c0_84 = arith.constant 0 : index
    %c0_85 = arith.constant 0 : index
    %c0_86 = arith.constant 0 : index
    %52 = vector.load %arg8[%c0_83, %c0_84, %c0_85, %c0_86] : memref<2x8x8x36xf32, #tpu.memory_space<vmem>>, vector<2x8x8x36xf32>
    %53 = vector.shape_cast %52 : vector<2x8x8x36xf32> to vector<128x36xf32>
    %c0_87 = arith.constant 0 : index
    %c0_88 = arith.constant 0 : index
    %54 = vector.load %arg3[%c0_87, %c0_88] : memref<36x4xf32, #tpu.memory_space<vmem>>, vector<36x4xf32>
    %cst_89 = arith.constant dense<0.000000e+00> : vector<128x4xf32>
    %55 = tpu.matmul %53, %54, %cst_89 {dimension_numbers = #tpu.dot_dimension_numbers<[1], [0], [0], [1], [0, 0, 1, 1], [], []>} : vector<128x36xf32>, vector<36x4xf32>, vector<128x4xf32> -> vector<128x4xf32>
    %c1_90 = arith.constant 1 : index
    %c0_91 = arith.constant 0 : index
    %56 = vector.load %arg5[%c1_90, %c0_91] : memref<2x4xf32, #tpu.memory_space<vmem>>, vector<1x4xf32>
    %57 = vector.broadcast %56 : vector<1x4xf32> to vector<128x4xf32>
    %58 = arith.addf %55, %57 : vector<128x4xf32>
    %cst_92 = arith.constant 0.000000e+00 : f32
    %59 = vector.broadcast %cst_92 : f32 to vector<128x4xf32>
    %60 = arith.maximumf %58, %59 : vector<128x4xf32>
    %c0_93 = arith.constant 0 : index
    %c0_94 = arith.constant 0 : index
    %61 = vector.load %arg4[%c0_93, %c0_94] : memref<4x16xf32, #tpu.memory_space<vmem>>, vector<4x16xf32>
    %cst_95 = arith.constant dense<0.000000e+00> : vector<128x16xf32>
    %62 = tpu.matmul %60, %61, %cst_95 {dimension_numbers = #tpu.dot_dimension_numbers<[1], [0], [0], [1], [0, 0, 1, 1], [], []>} : vector<128x4xf32>, vector<4x16xf32>, vector<128x16xf32> -> vector<128x16xf32>
    %c0_96 = arith.constant 0 : index
    %c0_97 = arith.constant 0 : index
    %63 = vector.load %arg6[%c0_96, %c0_97] : memref<1x16xf32, #tpu.memory_space<vmem>>, vector<1x16xf32>
    %64 = vector.broadcast %63 : vector<1x16xf32> to vector<128x16xf32>
    %65 = arith.addf %62, %64 : vector<128x16xf32>
    %66 = arith.addf %65, %1 : vector<128x16xf32>
    %cst_98 = arith.constant 0.000000e+00 : f32
    %67 = vector.broadcast %cst_98 : f32 to vector<128x16xf32>
    %68 = arith.maximumf %66, %67 : vector<128x16xf32>
    %69 = vector.shape_cast %68 : vector<128x16xf32> to vector<2x8x8x16xf32>
    %c0_99 = arith.constant 0 : index
    %c0_100 = arith.constant 0 : index
    %c0_101 = arith.constant 0 : index
    %c0_102 = arith.constant 0 : index
    %70 = vector.load %arg7[%c0_99, %c0_100, %c0_101, %c0_102] : memref<2x8x8x16xf32, #tpu.memory_space<vmem>>, vector<2x8x8x16xf32>
    tpu.vector_store %arg7[%c0_99, %c0_100, %c0_101, %c0_102], %69 {strides = array<i32>} : memref<2x8x8x16xf32, #tpu.memory_space<vmem>>, vector<2x8x8x16xf32>,
    return
  }
  func.func @transform_0(%arg0: i32) -> (i32, i32, i32, i32) {
    %c0_i32 = arith.constant 0 : i32
    %c0_i32_0 = arith.constant 0 : i32
    %c0_i32_1 = arith.constant 0 : i32
    %c0_i32_2 = arith.constant 0 : i32
    return %arg0, %c0_i32, %c0_i32_0, %c0_i32_1 : i32, i32, i32, i32
  }
  func.func @transform_1(%arg0: i32) -> (i32, i32) {
    %c0_i32 = arith.constant 0 : i32
    %c0_i32_0 = arith.constant 0 : i32
    %c0_i32_1 = arith.constant 0 : i32
    return %c0_i32, %c0_i32_0 : i32, i32
  }
  func.func @transform_2(%arg0: i32) -> (i32, i32) {
    %c0_i32 = arith.constant 0 : i32
    %c0_i32_0 = arith.constant 0 : i32
    %c0_i32_1 = arith.constant 0 : i32
    return %c0_i32, %c0_i32_0 : i32, i32
  }
  func.func @transform_3(%arg0: i32) -> (i32, i32) {
    %c0_i32 = arith.constant 0 : i32
    %c0_i32_0 = arith.constant 0 : i32
    %c0_i32_1 = arith.constant 0 : i32
    return %c0_i32, %c0_i32_0 : i32, i32
  }
  func.func @transform_4(%arg0: i32) -> (i32, i32) {
    %c0_i32 = arith.constant 0 : i32
    %c0_i32_0 = arith.constant 0 : i32
    %c0_i32_1 = arith.constant 0 : i32
    return %c0_i32, %c0_i32_0 : i32, i32
  }
  func.func @transform_5(%arg0: i32) -> (i32, i32) {
    %c0_i32 = arith.constant 0 : i32
    %c0_i32_0 = arith.constant 0 : i32
    %c0_i32_1 = arith.constant 0 : i32
    return %c0_i32, %c0_i32_0 : i32, i32
  }
  func.func @transform_6(%arg0: i32) -> (i32, i32, i32, i32) {
    %c0_i32 = arith.constant 0 : i32
    %c0_i32_0 = arith.constant 0 : i32
    %c0_i32_1 = arith.constant 0 : i32
    %c0_i32_2 = arith.constant 0 : i32
    return %arg0, %c0_i32, %c0_i32_0, %c0_i32_1 : i32, i32, i32, i32
  }
}

</mosaic_0001>

<bundles_post_ra>
// kernel: tpu_custom_call.1
= control target key start
LH: loop header
LB: loop body
LE: loop exit
PB: predicated region body
PF: predicated region fallthrough
CT: control target
= control target key end

     0   :  { %11 = vsyncpa [#allocation4], 0  ;;  %s2528_s0 = inlined_call_operand.hbm [shape: f32[2,8,8,16], index: 0, kind: input, shape index: {}]   ;;  %s2529_s1 = inlined_call_operand.vmem [shape: f32[16,4], index: 1, kind: input, shape index: {}]   ;;  %s2530_s2 = inlined_call_operand.vmem [shape: f32[36,4], index: 2, kind: input, shape index: {}]   ;;  %s2531_s3 = inlined_call_operand.vmem [shape: f32[4,16], index: 3, kind: input, shape index: {}]   ;;  %s2532_s4 = inlined_call_operand.vmem [shape: f32[2,4], index: 4, kind: input, shape index: {}]   ;;  %s2533_s5 = inlined_call_operand.vmem [shape: f32[1,16], index: 5, kind: input, shape index: {}]   ;;  %s2534_s6 = inlined_call_operand.hbm [shape: f32[2,8,8,16], index: 6, kind: output, shape index: {}]  }
   0x1   :  { %12 = vsyncpa [#allocation5], 0  ;;  %s1690_s21 = smov [#allocation3]   ;;  %s1642_s25 = scalar_lea.hbm %s2528_s0, 2048 }
   0x2   :  { %s18_s22 = sshll.u32 %s1690_s21, 4  ;;  %p1643_p0 = scmp.ne.s32.totalorder %s2528_s0, %s1642_s25  ;;  %s19_s22 = int_to_ptr.vmem [resolvable:$true] %s18_s22 }
   0x3   :  { %p1646_p1 = scmp.lt.u32.totalorder %s1642_s25, %s2528_s0 }
   0x5   :  { %p1648_p2 = pnand %p1646_p1, %p1643_p0 }
   0x7   :  { %1651 = shalt.err (!%p1648_p2)
}
   0x8   :  { %s1652_s30 = scalar_lea.vmem %s19_s22, 2048  ;;  %p1657_p4 = scmp.lt.s32.totalorder %s19_s22, %s19_s22 }
   0x9   :  { %p1653_p3 = scmp.ne.s32.totalorder %s19_s22, %s1652_s30  ;;  %p1658_p5 = scmp.lt.s32.totalorder %s1652_s30, %s1652_s30 }
   0xb   :  { %p1659_p6 = por %p1658_p5, %p1657_p4 }
   0xd   :  { %p1660_p7 = pnand %p1659_p6, %p1653_p3 }
   0xf   :  { %1663 = shalt.err (!%p1660_p7)
}
  0x10   :  { %s1691_s7 = smov 128   ;;  %s1692_s8 = smov 8  }
  0x11   :  { %24 = dma.hbm_to_vmem [thread:$0]  %s2528_s0, 2048, %s19_s22, [#allocation4], %s1691_s7, %s1691_s7, %s1692_s8  }
  0x12   :  { %1686 = dma.done.wait [#allocation4], 2048  }
  0x13   :  { %1687 = vsyncadd [#allocation4], 4294965248  ;;  %vm2535_vm0 = vcmask 130048   ;;  %v54_v0 = vld [vmem:[%s2529_s1] sm:$0xff]  ;;  %v55_v1 = vld [vmem:[%s2529_s1 + $0x8] sm:$0xff]  ;;  %vm290_vm1 = vcmask 24576  }
  0x14   :  { %v38_v2 = vld [vmem:[#allocation3] sm:$0xff]  ;;  %v1600_v3 = vpack.c.bf16 %v55_v1, %v54_v0  ;;  %v39_v5 = vld [vmem:[#allocation3 + $0x8] sm:$0xff]  ;;  %v40_v7 = vld [vmem:[#allocation3 + $0x10] sm:$0xff]  ;;  %v1693_v19 = vmov 0.0   ;;  %vm272_vm2 = vcmask 30720   ;;  %s1694_s15 = smov 16  }
  0x15   :  { %1516 = vmatprep.mubr.msk.f32.mxu0 %vm2535_vm0, %v38_v2  ;;  %v46_v4 = vld [vmem:[#allocation3 + $0x40] sm:$0xff]  ;;  %v47_v6 = vld [vmem:[#allocation3 + $0x48] sm:$0xff]  ;;  %v48_v8 = vld [vmem:[#allocation3 + $0x50] sm:$0xff]  ;;  %292 = vst.msk [vmem:[#allocation2 + $0x10] sm:$0x1] %vm290_vm1, %v1693_v19  ;;  %s1695_s16 = smov 12  }
  0x16   :  { %1528 = vmatprep.mubr.msk.f32.mxu1 %vm2535_vm0, %v46_v4  ;;  %1601 = vmatprep.subr.bf16.mxu0 %v1600_v3  ;;  %v41_v9 = vld [vmem:[#allocation3 + $0x18] sm:$0xff]  ;;  %v42_v11 = vld [vmem:[#allocation3 + $0x20] sm:$0xff]  ;;  %v43_v13 = vld [vmem:[#allocation3 + $0x28] sm:$0xff]  ;;  %291 = vst.msk [vmem:[#allocation2 + $0x8] sm:$0x1] %vm290_vm1, %v1693_v19  ;;  %s1696_s17 = smov 20  }
  0x17   :  { %1612 = vmatprep.subr.bf16.mxu1 %v1600_v3  ;;  %1603 = vmatpush3.bf16.msra.mxu0 %v1600_v3  ;;  %v49_v10 = vld [vmem:[#allocation3 + $0x58] sm:$0xff]  ;;  %v50_v12 = vld [vmem:[#allocation3 + $0x60] sm:$0xff]  ;;  %v51_v14 = vld [vmem:[#allocation3 + $0x68] sm:$0xff]  ;;  %293 = vst.msk [vmem:[#allocation2 + $0x18] sm:$0x1] %vm290_vm1, %v1693_v19  ;;  %s1697_s18 = smov 4  }
  0x18   :  { %1613 = vmatpush3.bf16.msra.mxu1 %v1600_v3  ;;  %v44_v15 = vld [vmem:[#allocation3 + $0x30] sm:$0xff]  ;;  %v45_v17 = vld [vmem:[#allocation3 + $0x38] sm:$0xff]  ;;  %294 = vst.msk [vmem:[#allocation2 + $0x20] sm:$0x1] %vm290_vm1, %v1693_v19  ;;  %295 = vst.msk [vmem:[#allocation2 + $0x28] sm:$0x1] %vm290_vm1, %v1693_v19 }
  0x19   :  { %v52_v16 = vld [vmem:[#allocation3 + $0x70] sm:$0xff]  ;;  %v53_v18 = vld [vmem:[#allocation3 + $0x78] sm:$0xff]  ;;  %296 = vst.msk [vmem:[#allocation2 + $0x30] sm:$0x1] %vm290_vm1, %v1693_v19  ;;  %297 = vst.msk [vmem:[#allocation2 + $0x38] sm:$0x1] %vm290_vm1, %v1693_v19 }
  0x1a   :  { %1517 = vmatmul.mubr.msk.f32.vlgmr.msra.gmra.mrb[0].mxu0 %vm2535_vm0, %v39_v5  ;;  %298 = vst.msk [vmem:[#allocation2 + $0x48] sm:$0x1] %vm290_vm1, %v1693_v19  ;;  %299 = vst.msk [vmem:[#allocation2 + $0x50] sm:$0x1] %vm290_vm1, %v1693_v19  ;;  %v1791_v20 = vld [vmem:[%s2532_s4] ss:$0 sm:$0xff] }
  0x1b   :  { %1529 = vmatmul.mubr.msk.f32.vlgmr.msra.gmra.mrb[0].mxu1 %vm2535_vm0, %v47_v6  ;;  %1519 = vmatprep.mubr.msk.f32.mxu0 %vm2535_vm0, %v40_v7  ;;  %300 = vst.msk [vmem:[#allocation2 + $0x58] sm:$0x1] %vm290_vm1, %v1693_v19  ;;  %301 = vst.msk [vmem:[#allocation2 + $0x60] sm:$0x1] %vm290_vm1, %v1693_v19  ;;  %s1698_s19 = smov 24   ;;  %s1699_s20 = smov 28  }
  0x1c   :  { %1531 = vmatprep.mubr.msk.f32.mxu1 %vm2535_vm0, %v48_v8  ;;  %302 = vst.msk [vmem:[#allocation2 + $0x68] sm:$0x1] %vm290_vm1, %v1693_v19  ;;  %303 = vst.msk [vmem:[#allocation2 + $0x70] sm:$0x1] %vm290_vm1, %v1693_v19  ;;  %vm2536_vm3 = vcmask 31744   ;;  %s1700_s21 = smov 32  }
  0x1d   :  { %304 = vst.msk [vmem:[#allocation2 + $0x78] sm:$0x1] %vm290_vm1, %v1693_v19  ;;  %vm361_vm4 = vcmask 64544   ;;  %vm435_vm5 = vcmask 97344   ;;  %vm520_vm6 = vcmask 122976   ;;  %v910_v3 = vld [vmem:[%s2530_s2] sm:$0xff] }
  0x1e   :  { %1520 = vmatmul.mubr.msk.f32.gmra.mrb[2].mxu0 %vm2535_vm0, %v41_v9  ;;  %288 = vst.msk [vmem:[#allocation2] sm:$0xff] %vm2536_vm3, %v1693_v19  ;;  %289 = vst.msk [vmem:[#allocation2 + $0x40] sm:$0xff] %vm2536_vm3, %v1693_v19  ;;  %v911_v4 = vld [vmem:[%s2530_s2 + $0x8] sm:$0xff]  ;;  %v912_v6 = vld [vmem:[%s2530_s2 + $0x10] sm:$0xff]  ;;  %vm969_vm7 = vcmask 1043456   ;;  %vm438_vm8 = vcmask 90176  }
  0x1f   :  { %1532 = vmatmul.mubr.msk.f32.gmra.mrb[2].mxu1 %vm2535_vm0, %v49_v10  ;;  %1522 = vmatprep.mubr.msk.f32.mxu0 %vm2535_vm0, %v42_v11  ;;  %376 = vst.msk [vmem:[#allocation2] sm:$0xff] %vm361_vm4, %v1693_v19  ;;  %377 = vst.msk [vmem:[#allocation2 + $0x40] sm:$0xff] %vm361_vm4, %v1693_v19  ;;  %v1604_v5 = vpack.c.bf16 %v911_v4, %v910_v3  ;;  %v913_v7 = vld [vmem:[%s2530_s2 + $0x18] sm:$0xff]  ;;  %v914_v9 = vld [vmem:[%s2530_s2 + $0x20] sm:$0xf]  ;;  %vm420_vm9 = vcmask 97345  }
  0x20   :  { %1534 = vmatprep.mubr.msk.f32.mxu1 %vm2535_vm0, %v50_v12  ;;  %436 = vst.msk [vmem:[#allocation2] sm:$0xff] %vm435_vm5, %v1693_v19  ;;  %437 = vst.msk [vmem:[#allocation2 + $0x40] sm:$0xff] %vm435_vm5, %v1693_v19  ;;  %v1608_v8 = vpack.c.bf16 %v913_v7, %v912_v6  ;;  %vm503_vm10 = vcmask 129120   ;;  %vm585_vm11 = vcmask 162944   ;;  %vm650_vm12 = vcmask 195745  }
  0x21   :  { %521 = vst.msk [vmem:[#allocation2] sm:$0x1] %vm520_vm6, %v1693_v19  ;;  %529 = vst.msk [vmem:[#allocation2 + $0x40] sm:$0x1] %vm520_vm6, %v1693_v19  ;;  %1605 = vmatprep.subr.bf16.mxu1 %v1604_v5  ;;  %vm667_vm13 = vcmask 188576   ;;  %vm745_vm14 = vcmask 221376  }
  0x22   :  { %1523 = vmatmul.mubr.msk.f32.gmra.mrb[4].mxu0 %vm2535_vm0, %v43_v13  ;;  %1607 = vmatpush3.bf16.msra.mxu1 %v1604_v5  ;;  %vm726_vm15 = vcmask 227520   ;;  %vm802_vm1 = vcmask 261344   ;;  %vm879_vm5 = vcmask 286976   ;;  %vm876_vm3 = vcmask 294144  }
  0x23   :  { %1535 = vmatmul.mubr.msk.f32.gmra.mrb[4].mxu1 %vm2535_vm0, %v51_v14  ;;  %1525 = vmatprep.mubr.msk.f32.mxu0 %vm2535_vm0, %v44_v15 }
  0x24   :  { %1537 = vmatprep.mubr.msk.f32.mxu1 %vm2535_vm0, %v52_v16  ;;  %1609 = vmatprep.subr.bf16.mxu1 %v1608_v8 }
  0x26   :  { %1526 = vmatmul.mubr.msk.f32.gmra.mrb[6].mxu0 %vm2535_vm0, %v45_v17  ;;  %1611 = vmatpush3.bf16.msra.mxu1 %v1608_v8 }
  0x27   :  { %1538 = vmatmul.mubr.msk.f32.gmra.mrb[6].mxu1 %vm2535_vm0, %v53_v18  ;;  %1548 = vmatprep.subr.msk.mxu1 %vm969_vm7, %v914_v9  ;;  %vm920_vm0 = vcmask 293888  }
  0x2a   :  { %1549 = vmatpush3.msk.msra.mxu1 %vm969_vm7, %v914_v9 }
  0xed   :  { %v1518_v21 = vpop.f32.mrb[0].mxu0 }
  0xee   :  { %v1530_v22 = vpop.f32.mrb[0].mxu1  ;;  %v182_v23 = vadd.f32 %v1518_v21, %v1791_v20  ;;  %v176_v24 = vpop.f32.mrb[1].mxu0 }
  0xef   :  { %v222_v25 = vadd.f32 %v1530_v22, %v1791_v20  ;;  %v216_v26 = vpop.f32.mrb[1].mxu1  ;;  %v177_v27 = vadd.f32 %v1791_v20, %v176_v24 }
  0xf0   :  { %v217_v28 = vadd.f32 %v1791_v20, %v216_v26  ;;  %v256_v29 = vmax.f32 %v182_v23, 0.0 }
  0xf1   :  { %v1797_v30 = vmax.f32 %v222_v25, 0.0  ;;  %v1799_v31 = vmax.f32 %v177_v27, 0.0  ;;  %v1521_v33 = vpop.f32.mrb[2].mxu0 }
  0xf2   :  { %v1801_v32 = vmax.f32 %v217_v28, 0.0  ;;  %v1533_v34 = vpop.f32.mrb[2].mxu1  ;;  %539 = vrot.lane.b32.xlu0 %v256_v29, %s1694_s15  ;;  %457 = vrot.lane.b32.xlu1 %v256_v29, %s1695_s16  ;;  %v192_v35 = vadd.f32 %v1521_v33, %v1791_v20  ;;  %v186_v36 = vpop.f32.mrb[3].mxu0  ;;  %274 = vst.msk [vmem:[#allocation2 + $0x11] sm:$0x7f] %vm272_vm2, %v256_v29 }
  0xf3   :  { %v232_v37 = vadd.f32 %v1533_v34, %v1791_v20  ;;  %v226_v38 = vpop.f32.mrb[3].mxu1  ;;  %281 = vst.msk [vmem:[#allocation2 + $0x51] sm:$0x7f] %vm272_vm2, %v1797_v30  ;;  %v187_v39 = vadd.f32 %v1791_v20, %v186_v36  ;;  %273 = vst.msk [vmem:[#allocation2 + $0x9] sm:$0x7f] %vm272_vm2, %v1799_v31 }
  0xf4   :  { %v227_v40 = vadd.f32 %v1791_v20, %v226_v38  ;;  %280 = vst.msk [vmem:[#allocation2 + $0x49] sm:$0x7f] %vm272_vm2, %v1801_v32  ;;  %v1816_v41 = vmax.f32 %v192_v35, 0.0 }
  0xf5   :  { %v1818_v42 = vmax.f32 %v232_v37, 0.0  ;;  %v1820_v43 = vmax.f32 %v187_v39, 0.0  ;;  %v1524_v45 = vpop.f32.mrb[4].mxu0 }
  0xf6   :  { %v1822_v44 = vmax.f32 %v227_v40, 0.0  ;;  %v1536_v46 = vpop.f32.mrb[4].mxu1  ;;  %604 = vrot.lane.b32.xlu0 %v256_v29, %s1696_s17  ;;  %321 = vrot.lane.b32.xlu1 %v256_v29, %s1697_s18  ;;  %v202_v47 = vadd.f32 %v1524_v45, %v1791_v20  ;;  %v196_v48 = vpop.f32.mrb[5].mxu0  ;;  %276 = vst.msk [vmem:[#allocation2 + $0x21] sm:$0x7f] %vm272_vm2, %v1816_v41 }
  0xf7   :  { %283 = vst.msk [vmem:[#allocation2 + $0x61] sm:$0x7f] %vm272_vm2, %v1818_v42  ;;  %v242_v49 = vadd.f32 %v1536_v46, %v1791_v20  ;;  %v236_v50 = vpop.f32.mrb[5].mxu1  ;;  %v197_v51 = vadd.f32 %v1791_v20, %v196_v48  ;;  %275 = vst.msk [vmem:[#allocation2 + $0x19] sm:$0x7f] %vm272_vm2, %v1820_v43 }
  0xf8   :  { %282 = vst.msk [vmem:[#allocation2 + $0x59] sm:$0x7f] %vm272_vm2, %v1822_v44  ;;  %v237_v52 = vadd.f32 %v1791_v20, %v236_v50  ;;  %v1838_v53 = vmax.f32 %v202_v47, 0.0 }
  0xf9   :  { %v1840_v54 = vmax.f32 %v242_v49, 0.0  ;;  %v1842_v55 = vmax.f32 %v197_v51, 0.0  ;;  %v1527_v57 = vpop.f32.mrb[6].mxu0 }
  0xfa   :  { %v1844_v56 = vmax.f32 %v237_v52, 0.0  ;;  %335 = vrot.lane.b32.xlu0 %v1797_v30, %s1697_s18  ;;  %380 = vrot.lane.b32.xlu1 %v256_v29, %s1692_s8  ;;  %278 = vst.msk [vmem:[#allocation2 + $0x31] sm:$0x7f] %vm272_vm2, %v1838_v53  ;;  %v1905_v58 = vadd.f32 %v1527_v57, %v1791_v20  ;;  %v206_v59 = vpop.f32.mrb[7].mxu0  ;;  %v1539_v62 = vpop.f32.mrb[6].mxu1 }
  0xfb   :  { %285 = vst.msk [vmem:[#allocation2 + $0x71] sm:$0x7f] %vm272_vm2, %v1840_v54  ;;  %277 = vst.msk [vmem:[#allocation2 + $0x29] sm:$0x7f] %vm272_vm2, %v1842_v55  ;;  %v207_v60 = vadd.f32 %v1791_v20, %v206_v59  ;;  %v1921_v63 = vadd.f32 %v1539_v62, %v1791_v20  ;;  %v246_v0 = vpop.f32.mrb[7].mxu1 }
  0xfc   :  { %284 = vst.msk [vmem:[#allocation2 + $0x69] sm:$0x7f] %vm272_vm2, %v1844_v56  ;;  %v247_v1 = vadd.f32 %v1791_v20, %v246_v0 }
  0xfd   :  { %v1912_v61 = vmax.f32 %v207_v60, 0.0  ;;  %v2159_v49 = vmax.f32 %v1921_v63, 0.0 }
  0xfe   :  { %394 = vrot.lane.b32.xlu0 %v1797_v30, %s1692_s8  ;;  %684 = vrot.lane.b32.xlu1 %v256_v29, %s1698_s19  ;;  %v1928_v2 = vmax.f32 %v247_v1, 0.0 }
  0xff   :  { %279 = vst.msk [vmem:[#allocation2 + $0x39] sm:$0x7f] %vm272_vm2, %v1912_v61 }
 0x100   :  { %286 = vst.msk [vmem:[#allocation2 + $0x79] sm:$0x7f] %vm272_vm2, %v1928_v2  ;;  %vm861_vm2 = vcmask 294145  }
 0x102   :  { %698 = vrot.lane.b32.xlu0 %v1797_v30, %s1698_s19  ;;  %760 = vrot.lane.b32.xlu1 %v256_v29, %s1699_s20 }
 0x106   :  { %774 = vrot.lane.b32.xlu0 %v1797_v30, %s1699_s20  ;;  %819 = vrot.lane.b32.xlu1 %v256_v29, %s1700_s21 }
 0x10a   :  { %833 = vrot.lane.b32.xlu0 %v1797_v30, %s1700_s21  ;;  %473 = vrot.lane.b32.xlu1 %v1797_v30, %s1695_s16 }
 0x10e   :  { %555 = vrot.lane.b32.xlu1 %v1797_v30, %s1694_s15  ;;  %319 = vrot.lane.b32.xlu0 %v1799_v31, %s1697_s18 }
 0x112   :  { %620 = vrot.lane.b32.xlu1 %v1797_v30, %s1696_s17  ;;  %378 = vrot.lane.b32.xlu0 %v1799_v31, %s1692_s8 }
 0x116   :  { %455 = vrot.lane.b32.xlu1 %v1799_v31, %s1695_s16  ;;  %537 = vrot.lane.b32.xlu0 %v1799_v31, %s1694_s15 }
 0x11a   :  { %602 = vrot.lane.b32.xlu1 %v1799_v31, %s1696_s17  ;;  %392 = vrot.lane.b32.xlu0 %v1801_v32, %s1692_s8 }
 0x11e   :  { %333 = vrot.lane.b32.xlu1 %v1801_v32, %s1697_s18  ;;  %553 = vrot.lane.b32.xlu0 %v1801_v32, %s1694_s15 }
 0x122   :  { %471 = vrot.lane.b32.xlu1 %v1801_v32, %s1695_s16  ;;  %618 = vrot.lane.b32.xlu0 %v1801_v32, %s1696_s17 }
 0x126   :  { %543 = vrot.lane.b32.xlu1 %v1816_v41, %s1694_s15  ;;  %461 = vrot.lane.b32.xlu0 %v1816_v41, %s1695_s16 }
 0x12a   :  { %384 = vrot.lane.b32.xlu1 %v1816_v41, %s1692_s8  ;;  %325 = vrot.lane.b32.xlu0 %v1816_v41, %s1697_s18 }
 0x12e   :  { %688 = vrot.lane.b32.xlu1 %v1816_v41, %s1698_s19  ;;  %608 = vrot.lane.b32.xlu0 %v1816_v41, %s1696_s17 }
 0x132   :  { %764 = vrot.lane.b32.xlu1 %v1816_v41, %s1699_s20  ;;  %559 = vrot.lane.b32.xlu0 %v1818_v42, %s1694_s15 }
 0x136   :  { %823 = vrot.lane.b32.xlu1 %v1816_v41, %s1700_s21  ;;  %398 = vrot.lane.b32.xlu0 %v1818_v42, %s1692_s8 }
 0x13a   :  { %477 = vrot.lane.b32.xlu1 %v1818_v42, %s1695_s16  ;;  %702 = vrot.lane.b32.xlu0 %v1818_v42, %s1698_s19 }
 0x13e   :  { %339 = vrot.lane.b32.xlu1 %v1818_v42, %s1697_s18  ;;  %778 = vrot.lane.b32.xlu0 %v1818_v42, %s1699_s20 }
 0x142   :  { %624 = vrot.lane.b32.xlu1 %v1818_v42, %s1696_s17  ;;  %837 = vrot.lane.b32.xlu0 %v1818_v42, %s1700_s21 }
 0x146   :  { %459 = vrot.lane.b32.xlu1 %v1820_v43, %s1695_s16  ;;  %323 = vrot.lane.b32.xlu0 %v1820_v43, %s1697_s18 }
 0x14a   :  { %541 = vrot.lane.b32.xlu1 %v1820_v43, %s1694_s15  ;;  %382 = vrot.lane.b32.xlu0 %v1820_v43, %s1692_s8 }
 0x14e   :  { %821 = vrot.lane.b32.xlu1 %v1820_v43, %s1700_s21  ;;  %686 = vrot.lane.b32.xlu0 %v1820_v43, %s1698_s19 }
 0x152   :  { %337 = vrot.lane.b32.xlu1 %v1822_v44, %s1697_s18  ;;  %762 = vrot.lane.b32.xlu0 %v1820_v43, %s1699_s20 }
 0x156   :  { %396 = vrot.lane.b32.xlu1 %v1822_v44, %s1692_s8  ;;  %606 = vrot.lane.b32.xlu0 %v1820_v43, %s1696_s17 }
 0x15a   :  { %700 = vrot.lane.b32.xlu1 %v1822_v44, %s1698_s19  ;;  %475 = vrot.lane.b32.xlu0 %v1822_v44, %s1695_s16 }
 0x15e   :  { %776 = vrot.lane.b32.xlu1 %v1822_v44, %s1699_s20  ;;  %557 = vrot.lane.b32.xlu0 %v1822_v44, %s1694_s15 }
 0x162   :  { %622 = vrot.lane.b32.xlu1 %v1822_v44, %s1696_s17  ;;  %835 = vrot.lane.b32.xlu0 %v1822_v44, %s1700_s21  ;;  %v262_v44 = vmax.f32 %v1905_v58, 0.0 }
 0x164   :  { %v540_v10 = vpop.permute.xlu0 %539  ;;  %v458_v11 = vpop.permute.xlu1 %457 }
 0x166   :  { %547 = vrot.lane.b32.xlu1 %v1838_v53, %s1694_s15  ;;  %465 = vrot.lane.b32.xlu0 %v1838_v53, %s1695_s16 }
 0x168   :  { %v605_v12 = vpop.permute.xlu0 %604  ;;  %v322_v13 = vpop.permute.xlu1 %321 }
 0x169   :  { %363 = vst.msk [vmem:[#allocation2 + $0x10] sm:$0xff] %vm361_vm4, %v322_v13 }
 0x16a   :  { %440 = vst.msk [vmem:[#allocation2 + $0x17] sm:$0x1] %vm438_vm8, %v1693_v19  ;;  %388 = vrot.lane.b32.xlu1 %v1838_v53, %s1692_s8  ;;  %329 = vrot.lane.b32.xlu0 %v1838_v53, %s1697_s18 }
 0x16c   :  { %v336_v14 = vpop.permute.xlu0 %335  ;;  %v381_v15 = vpop.permute.xlu1 %380 }
 0x16d   :  { %370 = vst.msk [vmem:[#allocation2 + $0x50] sm:$0xff] %vm361_vm4, %v336_v14 }
 0x16e   :  { %422 = vst.msk [vmem:[#allocation2 + $0xf] sm:$0xfe] %vm420_vm9, %v381_v15  ;;  %692 = vrot.lane.b32.xlu1 %v1838_v53, %s1698_s19  ;;  %612 = vrot.lane.b32.xlu0 %v1838_v53, %s1696_s17 }
 0x16f   :  { %447 = vst.msk [vmem:[#allocation2 + $0x57] sm:$0x1] %vm438_vm8, %v1693_v19 }
 0x170   :  { %523 = vst.msk [vmem:[#allocation2 + $0x10] sm:$0x1] %vm520_vm6, %v1693_v19  ;;  %v395_v16 = vpop.permute.xlu0 %394  ;;  %v685_v17 = vpop.permute.xlu1 %684 }
 0x171   :  { %429 = vst.msk [vmem:[#allocation2 + $0x4f] sm:$0xfe] %vm420_vm9, %v395_v16 }
 0x172   :  { %531 = vst.msk [vmem:[#allocation2 + $0x50] sm:$0x1] %vm520_vm6, %v1693_v19  ;;  %768 = vrot.lane.b32.xlu1 %v1838_v53, %s1699_s20  ;;  %563 = vrot.lane.b32.xlu0 %v1840_v54, %s1694_s15 }
 0x174   :  { %v2033_v18 = vpop.permute.xlu0 %698  ;;  %v761_v20 = vpop.permute.xlu1 %760 }
 0x176   :  { %827 = vrot.lane.b32.xlu1 %v1838_v53, %s1700_s21  ;;  %402 = vrot.lane.b32.xlu0 %v1840_v54, %s1692_s8 }
 0x178   :  { %v2039_v21 = vpop.permute.xlu0 %774  ;;  %v820_v22 = vpop.permute.xlu1 %819 }
 0x17a   :  { %481 = vrot.lane.b32.xlu1 %v1840_v54, %s1695_s16  ;;  %706 = vrot.lane.b32.xlu0 %v1840_v54, %s1698_s19 }
 0x17c   :  { %v2045_v23 = vpop.permute.xlu0 %833  ;;  %v474_v24 = vpop.permute.xlu1 %473 }
 0x17e   :  { %343 = vrot.lane.b32.xlu1 %v1840_v54, %s1697_s18  ;;  %782 = vrot.lane.b32.xlu0 %v1840_v54, %s1699_s20 }
 0x180   :  { %v556_v25 = vpop.permute.xlu1 %555  ;;  %v320_v26 = vpop.permute.xlu0 %319 }
 0x181   :  { %362 = vst.msk [vmem:[#allocation2 + $0x8] sm:$0xff] %vm361_vm4, %v320_v26 }
 0x182   :  { %439 = vst.msk [vmem:[#allocation2 + $0xf] sm:$0x1] %vm438_vm8, %v1693_v19  ;;  %628 = vrot.lane.b32.xlu1 %v1840_v54, %s1696_s17  ;;  %841 = vrot.lane.b32.xlu0 %v1840_v54, %s1700_s21 }
 0x184   :  { %v621_v27 = vpop.permute.xlu1 %620  ;;  %v379_v28 = vpop.permute.xlu0 %378 }
 0x185   :  { %421 = vst.msk [vmem:[#allocation2 + $0x7] sm:$0xfe] %vm420_vm9, %v379_v28 }
 0x186   :  { %505 = vst.msk [vmem:[#allocation2 + $0x9] sm:$0x7f] %vm503_vm10, %v458_v11  ;;  %463 = vrot.lane.b32.xlu1 %v1842_v55, %s1695_s16  ;;  %327 = vrot.lane.b32.xlu0 %v1842_v55, %s1697_s18 }
 0x187   :  { %522 = vst.msk [vmem:[#allocation2 + $0x8] sm:$0x1] %vm520_vm6, %v1693_v19 }
 0x188   :  { %587 = vst.msk [vmem:[#allocation2 + $0x8] sm:$0xff] %vm585_vm11, %v540_v10  ;;  %v456_v29 = vpop.permute.xlu1 %455  ;;  %v538_v30 = vpop.permute.xlu0 %537 }
 0x189   :  { %669 = vst.msk [vmem:[#allocation2 + $0xf] sm:$0x1] %vm667_vm13, %v1693_v19 }
 0x18a   :  { %652 = vst.msk [vmem:[#allocation2 + $0x7] sm:$0xfe] %vm650_vm12, %v605_v12  ;;  %545 = vrot.lane.b32.xlu1 %v1842_v55, %s1694_s15  ;;  %386 = vrot.lane.b32.xlu0 %v1842_v55, %s1692_s8 }
 0x18b   :  { %504 = vst.msk [vmem:[#allocation2 + $0x1] sm:$0x7f] %vm503_vm10, %v456_v29 }
 0x18c   :  { %747 = vst.msk [vmem:[#allocation2 + $0x8] sm:$0x1] %vm745_vm14, %v1693_v19  ;;  %v603_v31 = vpop.permute.xlu1 %602  ;;  %v393_v32 = vpop.permute.xlu0 %392 }
 0x18d   :  { %586 = vst.msk [vmem:[#allocation2] sm:$0xff] %vm585_vm11, %v538_v30 }
 0x18e   :  { %668 = vst.msk [vmem:[#allocation2 + $0x7] sm:$0x1] %vm667_vm13, %v1693_v19  ;;  %825 = vrot.lane.b32.xlu1 %v1842_v55, %s1700_s21  ;;  %690 = vrot.lane.b32.xlu0 %v1842_v55, %s1698_s19 }
 0x18f   :  { %651 = vst.msk [vmem:[#allocation2 - $0x1] sm:$0xfe] %vm650_vm12, %v603_v31 }
 0x190   :  { %727 = vst.msk [vmem:[#allocation2 + $0x1] sm:$0x7f] %vm726_vm15, %v685_v17  ;;  %v334_v33 = vpop.permute.xlu1 %333  ;;  %v554_v34 = vpop.permute.xlu0 %553 }
 0x191   :  { %746 = vst.msk [vmem:[#allocation2] sm:$0x1] %vm745_vm14, %v1693_v19 }
 0x192   :  { %803 = vst.msk [vmem:[#allocation2] sm:$0xff] %vm802_vm1, %v761_v20  ;;  %341 = vrot.lane.b32.xlu1 %v1844_v56, %s1697_s18  ;;  %766 = vrot.lane.b32.xlu0 %v1842_v55, %s1699_s20 }
 0x193   :  { %862 = vst.msk [vmem:[#allocation2 - $0x1] sm:$0xfe] %vm861_vm2, %v820_v22 }
 0x194   :  { %880 = vst.msk [vmem:[#allocation2 + $0x7] sm:$0x1] %vm879_vm5, %v1693_v19  ;;  %v472_v35 = vpop.permute.xlu1 %471  ;;  %v619_v36 = vpop.permute.xlu0 %618 }
 0x195   :  { %369 = vst.msk [vmem:[#allocation2 + $0x48] sm:$0xff] %vm361_vm4, %v334_v33 }
 0x196   :  { %428 = vst.msk [vmem:[#allocation2 + $0x47] sm:$0xfe] %vm420_vm9, %v393_v32  ;;  %400 = vrot.lane.b32.xlu1 %v1844_v56, %s1692_s8  ;;  %610 = vrot.lane.b32.xlu0 %v1842_v55, %s1696_s17 }
 0x197   :  { %446 = vst.msk [vmem:[#allocation2 + $0x4f] sm:$0x1] %vm438_vm8, %v1693_v19 }
 0x198   :  { %513 = vst.msk [vmem:[#allocation2 + $0x49] sm:$0x7f] %vm503_vm10, %v474_v24  ;;  %512 = vst.msk [vmem:[#allocation2 + $0x41] sm:$0x7f] %vm503_vm10, %v472_v35  ;;  %v544_v38 = vpop.permute.xlu1 %543  ;;  %v462_v39 = vpop.permute.xlu0 %461 }
 0x199   :  { %530 = vst.msk [vmem:[#allocation2 + $0x48] sm:$0x1] %vm520_vm6, %v1693_v19 }
 0x19a   :  { %595 = vst.msk [vmem:[#allocation2 + $0x48] sm:$0xff] %vm585_vm11, %v556_v25  ;;  %594 = vst.msk [vmem:[#allocation2 + $0x40] sm:$0xff] %vm585_vm11, %v554_v34  ;;  %704 = vrot.lane.b32.xlu1 %v1844_v56, %s1698_s19  ;;  %479 = vrot.lane.b32.xlu0 %v1844_v56, %s1695_s16 }
 0x19b   :  { %660 = vst.msk [vmem:[#allocation2 + $0x47] sm:$0xfe] %vm650_vm12, %v621_v27  ;;  %659 = vst.msk [vmem:[#allocation2 + $0x3f] sm:$0xfe] %vm650_vm12, %v619_v36  ;;  %v894_v37 = vld [vmem:[#allocation2] sm:$0xff] }
 0x19c   :  { %677 = vst.msk [vmem:[#allocation2 + $0x4f] sm:$0x1] %vm667_vm13, %v1693_v19  ;;  %676 = vst.msk [vmem:[#allocation2 + $0x47] sm:$0x1] %vm667_vm13, %v1693_v19  ;;  %1550 = vmatprep.mubr.msk.f32.mxu1 %vm920_vm0, %v894_v37  ;;  %v385_v40 = vpop.permute.xlu1 %384  ;;  %v326_v41 = vpop.permute.xlu0 %325 }
 0x19d   :  { %754 = vst.msk [vmem:[#allocation2 + $0x48] sm:$0x1] %vm745_vm14, %v1693_v19  ;;  %753 = vst.msk [vmem:[#allocation2 + $0x40] sm:$0x1] %vm745_vm14, %v1693_v19 }
 0x19e   :  { %734 = vst.msk [vmem:[#allocation2 + $0x41] sm:$0x7f] %vm726_vm15, %v2033_v18  ;;  %780 = vrot.lane.b32.xlu1 %v1844_v56, %s1699_s20  ;;  %561 = vrot.lane.b32.xlu0 %v1844_v56, %s1694_s15 }
 0x19f   :  { %810 = vst.msk [vmem:[#allocation2 + $0x40] sm:$0xff] %vm802_vm1, %v2039_v21 }
 0x1a0   :  { %869 = vst.msk [vmem:[#allocation2 + $0x3f] sm:$0xfe] %vm861_vm2, %v2045_v23  ;;  %v2143_v42 = vpop.permute.xlu1 %688  ;;  %v609_v43 = vpop.permute.xlu0 %608 }
 0x1a1   :  { %887 = vst.msk [vmem:[#allocation2 + $0x47] sm:$0x1] %vm879_vm5, %v1693_v19 }
 0x1a2   :  { %365 = vst.msk [vmem:[#allocation2 + $0x20] sm:$0xff] %vm361_vm4, %v326_v41  ;;  %626 = vrot.lane.b32.xlu1 %v1844_v56, %s1696_s17  ;;  %839 = vrot.lane.b32.xlu0 %v1844_v56, %s1700_s21 }
 0x1a3   :  { %424 = vst.msk [vmem:[#allocation2 + $0x1f] sm:$0xfe] %vm420_vm9, %v385_v40 }
 0x1a4   :  { %442 = vst.msk [vmem:[#allocation2 + $0x27] sm:$0x1] %vm438_vm8, %v1693_v19  ;;  %v2150_v45 = vpop.permute.xlu1 %764  ;;  %v2152_v46 = vpop.permute.xlu0 %559 }
 0x1a5   :  { %525 = vst.msk [vmem:[#allocation2 + $0x20] sm:$0x1] %vm520_vm6, %v1693_v19 }
 0x1a6   :  { %696 = vrot.lane.b32.xlu1 %v262_v44, %s1698_s19  ;;  %469 = vrot.lane.b32.xlu0 %v262_v44, %s1695_s16 }
 0x1a8   :  { %v2156_v47 = vpop.permute.xlu1 %823  ;;  %v399_v48 = vpop.permute.xlu0 %398 }
 0x1aa   :  { %831 = vrot.lane.b32.xlu1 %v262_v44, %s1700_s21  ;;  %551 = vrot.lane.b32.xlu0 %v262_v44, %s1694_s15 }
 0x1ac   :  { %v478_v50 = vpop.permute.xlu1 %477  ;;  %v2163_v51 = vpop.permute.xlu0 %702 }
 0x1ae   :  { %485 = vrot.lane.b32.xlu1 %v2159_v49, %s1695_s16  ;;  %616 = vrot.lane.b32.xlu0 %v262_v44, %s1696_s17 }
 0x1b0   :  { %v340_v52 = vpop.permute.xlu1 %339  ;;  %v2168_v53 = vpop.permute.xlu0 %778 }
 0x1b1   :  { %372 = vst.msk [vmem:[#allocation2 + $0x60] sm:$0xff] %vm361_vm4, %v340_v52 }
 0x1b2   :  { %431 = vst.msk [vmem:[#allocation2 + $0x5f] sm:$0xfe] %vm420_vm9, %v399_v48  ;;  %567 = vrot.lane.b32.xlu1 %v2159_v49, %s1694_s15  ;;  %772 = vrot.lane.b32.xlu0 %v262_v44, %s1699_s20 }
 0x1b3   :  { %449 = vst.msk [vmem:[#allocation2 + $0x67] sm:$0x1] %vm438_vm8, %v1693_v19 }
 0x1b4   :  { %533 = vst.msk [vmem:[#allocation2 + $0x60] sm:$0x1] %vm520_vm6, %v1693_v19  ;;  %v625_v54 = vpop.permute.xlu1 %624  ;;  %v2179_v55 = vpop.permute.xlu0 %837 }
 0x1b6   :  { %467 = vrot.lane.b32.xlu1 %v1912_v61, %s1695_s16  ;;  %331 = vrot.lane.b32.xlu0 %v1912_v61, %s1697_s18 }
 0x1b8   :  { %v460_v56 = vpop.permute.xlu1 %459  ;;  %v324_v57 = vpop.permute.xlu0 %323 }
 0x1b9   :  { %506 = vst.msk [vmem:[#allocation2 + $0x11] sm:$0x7f] %vm503_vm10, %v460_v56 }
 0x1ba   :  { %364 = vst.msk [vmem:[#allocation2 + $0x18] sm:$0xff] %vm361_vm4, %v324_v57  ;;  %549 = vrot.lane.b32.xlu1 %v1912_v61, %s1694_s15  ;;  %390 = vrot.lane.b32.xlu0 %v1912_v61, %s1692_s8 }
 0x1bb   :  { %441 = vst.msk [vmem:[#allocation2 + $0x1f] sm:$0x1] %vm438_vm8, %v1693_v19 }
 0x1bc   :  { %v542_v58 = vpop.permute.xlu1 %541  ;;  %v383_v59 = vpop.permute.xlu0 %382 }
 0x1bd   :  { %588 = vst.msk [vmem:[#allocation2 + $0x10] sm:$0xff] %vm585_vm11, %v542_v58 }
 0x1be   :  { %423 = vst.msk [vmem:[#allocation2 + $0x17] sm:$0xfe] %vm420_vm9, %v383_v59  ;;  %614 = vrot.lane.b32.xlu1 %v1912_v61, %s1696_s17  ;;  %694 = vrot.lane.b32.xlu0 %v1912_v61, %s1698_s19 }
 0x1bf   :  { %670 = vst.msk [vmem:[#allocation2 + $0x17] sm:$0x1] %vm667_vm13, %v1693_v19 }
 0x1c0   :  { %507 = vst.msk [vmem:[#allocation2 + $0x19] sm:$0x7f] %vm503_vm10, %v462_v39  ;;  %v822_v60 = vpop.permute.xlu1 %821  ;;  %v687_v62 = vpop.permute.xlu0 %686 }
 0x1c1   :  { %524 = vst.msk [vmem:[#allocation2 + $0x18] sm:$0x1] %vm520_vm6, %v1693_v19 }
 0x1c2   :  { %589 = vst.msk [vmem:[#allocation2 + $0x18] sm:$0xff] %vm585_vm11, %v544_v38  ;;  %710 = vrot.lane.b32.xlu1 %v2159_v49, %s1698_s19  ;;  %770 = vrot.lane.b32.xlu0 %v1912_v61, %s1699_s20 }
 0x1c3   :  { %654 = vst.msk [vmem:[#allocation2 + $0x17] sm:$0xfe] %vm650_vm12, %v609_v43 }
 0x1c4   :  { %671 = vst.msk [vmem:[#allocation2 + $0x1f] sm:$0x1] %vm667_vm13, %v1693_v19  ;;  %v338_v63 = vpop.permute.xlu1 %337  ;;  %v763_v0 = vpop.permute.xlu0 %762 }
 0x1c5   :  { %749 = vst.msk [vmem:[#allocation2 + $0x18] sm:$0x1] %vm745_vm14, %v1693_v19 }
 0x1c6   :  { %728 = vst.msk [vmem:[#allocation2 + $0x9] sm:$0x7f] %vm726_vm15, %v687_v62  ;;  %345 = vrot.lane.b32.xlu1 %v1928_v2, %s1697_s18  ;;  %829 = vrot.lane.b32.xlu0 %v1912_v61, %s1700_s21 }
 0x1c7   :  { %371 = vst.msk [vmem:[#allocation2 + $0x58] sm:$0xff] %vm361_vm4, %v338_v63 }
 0x1c8   :  { %804 = vst.msk [vmem:[#allocation2 + $0x8] sm:$0xff] %vm802_vm1, %v763_v0  ;;  %v397_v1 = vpop.permute.xlu1 %396  ;;  %v607_v3 = vpop.permute.xlu0 %606 }
 0x1c9   :  { %448 = vst.msk [vmem:[#allocation2 + $0x5f] sm:$0x1] %vm438_vm8, %v1693_v19 }
 0x1ca   :  { %863 = vst.msk [vmem:[#allocation2 + $0x7] sm:$0xfe] %vm861_vm2, %v822_v60  ;;  %404 = vrot.lane.b32.xlu1 %v1928_v2, %s1692_s8  ;;  %632 = vrot.lane.b32.xlu0 %v2159_v49, %s1696_s17 }
 0x1cb   :  { %881 = vst.msk [vmem:[#allocation2 + $0xf] sm:$0x1] %vm879_vm5, %v1693_v19 }
 0x1cc   :  { %430 = vst.msk [vmem:[#allocation2 + $0x57] sm:$0xfe] %vm420_vm9, %v397_v1  ;;  %v701_v61 = vpop.permute.xlu1 %700  ;;  %v476_v4 = vpop.permute.xlu0 %475 }
 0x1cd   :  { %653 = vst.msk [vmem:[#allocation2 + $0xf] sm:$0xfe] %vm650_vm12, %v607_v3 }
 0x1ce   :  { %515 = vst.msk [vmem:[#allocation2 + $0x59] sm:$0x7f] %vm503_vm10, %v478_v50  ;;  %514 = vst.msk [vmem:[#allocation2 + $0x51] sm:$0x7f] %vm503_vm10, %v476_v4  ;;  %708 = vrot.lane.b32.xlu1 %v1928_v2, %s1698_s19  ;;  %483 = vrot.lane.b32.xlu0 %v1928_v2, %s1695_s16 }
 0x1cf   :  { %532 = vst.msk [vmem:[#allocation2 + $0x58] sm:$0x1] %vm520_vm6, %v1693_v19 }
 0x1d0   :  { %729 = vst.msk [vmem:[#allocation2 + $0x11] sm:$0x7f] %vm726_vm15, %v2143_v42  ;;  %735 = vst.msk [vmem:[#allocation2 + $0x49] sm:$0x7f] %vm726_vm15, %v701_v61  ;;  %v777_v6 = vpop.permute.xlu1 %776  ;;  %v558_v7 = vpop.permute.xlu0 %557 }
 0x1d1   :  { %748 = vst.msk [vmem:[#allocation2 + $0x10] sm:$0x1] %vm745_vm14, %v1693_v19 }
 0x1d2   :  { %597 = vst.msk [vmem:[#allocation2 + $0x58] sm:$0xff] %vm585_vm11, %v2152_v46  ;;  %v895_v5 = vld [vmem:[#allocation2 + $0x8] sm:$0xff]  ;;  %596 = vst.msk [vmem:[#allocation2 + $0x50] sm:$0xff] %vm585_vm11, %v558_v7  ;;  %784 = vrot.lane.b32.xlu1 %v1928_v2, %s1699_s20  ;;  %565 = vrot.lane.b32.xlu0 %v1928_v2, %s1694_s15 }
 0x1d3   :  { %805 = vst.msk [vmem:[#allocation2 + $0x10] sm:$0xff] %vm802_vm1, %v2150_v45  ;;  %1551 = vmatmul.mubr.msk.f32.vlgmr.msra.gmra.mrb[8].mxu1 %vm920_vm0, %v895_v5  ;;  %811 = vst.msk [vmem:[#allocation2 + $0x48] sm:$0xff] %vm802_vm1, %v777_v6 }
 0x1d4   :  { %662 = vst.msk [vmem:[#allocation2 + $0x57] sm:$0xfe] %vm650_vm12, %v625_v54  ;;  %v623_v9 = vpop.permute.xlu1 %622  ;;  %v836_v10 = vpop.permute.xlu0 %835 }
 0x1d5   :  { %679 = vst.msk [vmem:[#allocation2 + $0x5f] sm:$0x1] %vm667_vm13, %v1693_v19  ;;  %678 = vst.msk [vmem:[#allocation2 + $0x57] sm:$0x1] %vm667_vm13, %v1693_v19 }
 0x1d6   :  { %864 = vst.msk [vmem:[#allocation2 + $0xf] sm:$0xfe] %vm861_vm2, %v2156_v47  ;;  %870 = vst.msk [vmem:[#allocation2 + $0x47] sm:$0xfe] %vm861_vm2, %v836_v10  ;;  %843 = vrot.lane.b32.xlu1 %v1928_v2, %s1700_s21  ;;  %630 = vrot.lane.b32.xlu0 %v1928_v2, %s1696_s17  ;;  %v902_v10 = vld [vmem:[#allocation2 + $0x40] sm:$0xff] }
 0x1d7   :  { %882 = vst.msk [vmem:[#allocation2 + $0x17] sm:$0x1] %vm879_vm5, %v1693_v19  ;;  %888 = vst.msk [vmem:[#allocation2 + $0x4f] sm:$0x1] %vm879_vm5, %v1693_v19 }
 0x1d8   :  { %756 = vst.msk [vmem:[#allocation2 + $0x58] sm:$0x1] %vm745_vm14, %v1693_v19  ;;  %v548_v11 = vpop.permute.xlu1 %547  ;;  %v466_v12 = vpop.permute.xlu0 %465 }
 0x1d9   :  { %661 = vst.msk [vmem:[#allocation2 + $0x4f] sm:$0xfe] %vm650_vm12, %v623_v9 }
 0x1da   :  { %736 = vst.msk [vmem:[#allocation2 + $0x51] sm:$0x7f] %vm726_vm15, %v2163_v51  ;;  %845 = vrot.lane.b32.xlu1 %v2159_v49, %s1700_s21  ;;  %786 = vrot.lane.b32.xlu0 %v2159_v49, %s1699_s20 }
 0x1db   :  { %755 = vst.msk [vmem:[#allocation2 + $0x50] sm:$0x1] %vm745_vm14, %v1693_v19 }
 0x1dc   :  { %812 = vst.msk [vmem:[#allocation2 + $0x50] sm:$0xff] %vm802_vm1, %v2168_v53  ;;  %v389_v13 = vpop.permute.xlu1 %388  ;;  %v330_v14 = vpop.permute.xlu0 %329  ;;  %v1134_v53 = vld [vmem:[%s2531_s3] sm:$0xf] }
 0x1dd   :  { %871 = vst.msk [vmem:[#allocation2 + $0x4f] sm:$0xfe] %vm861_vm2, %v2179_v55  ;;  %1574 = vmatprep.subr.msk.mxu0 %vm969_vm7, %v1134_v53 }
 0x1de   :  { %v896_v8 = vld [vmem:[#allocation2 + $0x10] sm:$0xff]  ;;  %889 = vst.msk [vmem:[#allocation2 + $0x57] sm:$0x1] %vm879_vm5, %v1693_v19  ;;  %1575 = vmatpush3.msk.msra.mxu0 %vm969_vm7, %v1134_v53  ;;  %vm742_vm7 = vcmask 228544  }
 0x1df   :  { %1553 = vmatprep.mubr.msk.f32.mxu1 %vm920_vm0, %v896_v8  ;;  %367 = vst.msk [vmem:[#allocation2 + $0x30] sm:$0xff] %vm361_vm4, %v330_v14 }
 0x1e0   :  { %426 = vst.msk [vmem:[#allocation2 + $0x2f] sm:$0xfe] %vm420_vm9, %v389_v13  ;;  %v693_v2 = vpop.permute.xlu1 %692  ;;  %v613_v15 = vpop.permute.xlu0 %612  ;;  %v903_v13 = vld [vmem:[#allocation2 + $0x48] sm:$0xff] }
 0x1e1   :  { %444 = vst.msk [vmem:[#allocation2 + $0x37] sm:$0x1] %vm438_vm8, %v1693_v19 }
 0x1e2   :  { %527 = vst.msk [vmem:[#allocation2 + $0x30] sm:$0x1] %vm520_vm6, %v1693_v19 }
 0x1e4   :  { %v769_v16 = vpop.permute.xlu1 %768  ;;  %v564_v17 = vpop.permute.xlu0 %563 }
 0x1e5   :  { %v904_v14 = vld [vmem:[#allocation2 + $0x50] sm:$0xff] }
 0x1e8   :  { %v828_v18 = vpop.permute.xlu1 %827  ;;  %v403_v20 = vpop.permute.xlu0 %402 }
 0x1ec   :  { %v482_v21 = vpop.permute.xlu1 %481  ;;  %v2296_v22 = vpop.permute.xlu0 %706 }
 0x1f0   :  { %v344_v23 = vpop.permute.xlu1 %343  ;;  %v2298_v24 = vpop.permute.xlu0 %782 }
 0x1f1   :  { %374 = vst.msk [vmem:[#allocation2 + $0x70] sm:$0xff] %vm361_vm4, %v344_v23 }
 0x1f2   :  { %433 = vst.msk [vmem:[#allocation2 + $0x6f] sm:$0xfe] %vm420_vm9, %v403_v20 }
 0x1f3   :  { %451 = vst.msk [vmem:[#allocation2 + $0x77] sm:$0x1] %vm438_vm8, %v1693_v19 }
 0x1f4   :  { %535 = vst.msk [vmem:[#allocation2 + $0x70] sm:$0x1] %vm520_vm6, %v1693_v19  ;;  %v629_v25 = vpop.permute.xlu1 %628  ;;  %v2306_v26 = vpop.permute.xlu0 %841 }
 0x1f8   :  { %v464_v27 = vpop.permute.xlu1 %463  ;;  %v328_v28 = vpop.permute.xlu0 %327 }
 0x1f9   :  { %508 = vst.msk [vmem:[#allocation2 + $0x21] sm:$0x7f] %vm503_vm10, %v464_v27 }
 0x1fa   :  { %366 = vst.msk [vmem:[#allocation2 + $0x28] sm:$0xff] %vm361_vm4, %v328_v28 }
 0x1fb   :  { %443 = vst.msk [vmem:[#allocation2 + $0x2f] sm:$0x1] %vm438_vm8, %v1693_v19 }
 0x1fc   :  { %v546_v29 = vpop.permute.xlu1 %545  ;;  %v387_v30 = vpop.permute.xlu0 %386 }
 0x1fd   :  { %590 = vst.msk [vmem:[#allocation2 + $0x20] sm:$0xff] %vm585_vm11, %v546_v29 }
 0x1fe   :  { %425 = vst.msk [vmem:[#allocation2 + $0x27] sm:$0xfe] %vm420_vm9, %v387_v30 }
 0x1ff   :  { %672 = vst.msk [vmem:[#allocation2 + $0x27] sm:$0x1] %vm667_vm13, %v1693_v19 }
 0x200   :  { %509 = vst.msk [vmem:[#allocation2 + $0x29] sm:$0x7f] %vm503_vm10, %v466_v12  ;;  %v826_v31 = vpop.permute.xlu1 %825  ;;  %v691_v32 = vpop.permute.xlu0 %690 }
 0x201   :  { %526 = vst.msk [vmem:[#allocation2 + $0x28] sm:$0x1] %vm520_vm6, %v1693_v19 }
 0x202   :  { %591 = vst.msk [vmem:[#allocation2 + $0x28] sm:$0xff] %vm585_vm11, %v548_v11 }
 0x203   :  { %656 = vst.msk [vmem:[#allocation2 + $0x27] sm:$0xfe] %vm650_vm12, %v613_v15 }
 0x204   :  { %673 = vst.msk [vmem:[#allocation2 + $0x2f] sm:$0x1] %vm667_vm13, %v1693_v19  ;;  %v342_v33 = vpop.permute.xlu1 %341  ;;  %v767_v34 = vpop.permute.xlu0 %766 }
 0x205   :  { %751 = vst.msk [vmem:[#allocation2 + $0x28] sm:$0x1] %vm745_vm14, %v1693_v19 }
 0x206   :  { %730 = vst.msk [vmem:[#allocation2 + $0x19] sm:$0x7f] %vm726_vm15, %v691_v32 }
 0x207   :  { %373 = vst.msk [vmem:[#allocation2 + $0x68] sm:$0xff] %vm361_vm4, %v342_v33 }
 0x208   :  { %806 = vst.msk [vmem:[#allocation2 + $0x18] sm:$0xff] %vm802_vm1, %v767_v34  ;;  %v401_v35 = vpop.permute.xlu1 %400  ;;  %v611_v36 = vpop.permute.xlu0 %610 }
 0x209   :  { %450 = vst.msk [vmem:[#allocation2 + $0x6f] sm:$0x1] %vm438_vm8, %v1693_v19 }
 0x20a   :  { %865 = vst.msk [vmem:[#allocation2 + $0x17] sm:$0xfe] %vm861_vm2, %v826_v31 }
 0x20b   :  { %883 = vst.msk [vmem:[#allocation2 + $0x1f] sm:$0x1] %vm879_vm5, %v1693_v19 }
 0x20c   :  { %432 = vst.msk [vmem:[#allocation2 + $0x67] sm:$0xfe] %vm420_vm9, %v401_v35  ;;  %v705_v37 = vpop.permute.xlu1 %704  ;;  %v480_v38 = vpop.permute.xlu0 %479 }
 0x20d   :  { %655 = vst.msk [vmem:[#allocation2 + $0x1f] sm:$0xfe] %vm650_vm12, %v611_v36 }
 0x20e   :  { %517 = vst.msk [vmem:[#allocation2 + $0x69] sm:$0x7f] %vm503_vm10, %v482_v21  ;;  %516 = vst.msk [vmem:[#allocation2 + $0x61] sm:$0x7f] %vm503_vm10, %v480_v38 }
 0x20f   :  { %534 = vst.msk [vmem:[#allocation2 + $0x68] sm:$0x1] %vm520_vm6, %v1693_v19 }
 0x210   :  { %731 = vst.msk [vmem:[#allocation2 + $0x21] sm:$0x7f] %vm726_vm15, %v693_v2  ;;  %737 = vst.msk [vmem:[#allocation2 + $0x59] sm:$0x7f] %vm726_vm15, %v705_v37  ;;  %v781_v40 = vpop.permute.xlu1 %780  ;;  %v562_v41 = vpop.permute.xlu0 %561 }
 0x211   :  { %750 = vst.msk [vmem:[#allocation2 + $0x20] sm:$0x1] %vm745_vm14, %v1693_v19 }
 0x212   :  { %599 = vst.msk [vmem:[#allocation2 + $0x68] sm:$0xff] %vm585_vm11, %v564_v17  ;;  %v897_v39 = vld [vmem:[#allocation2 + $0x18] sm:$0xff]  ;;  %598 = vst.msk [vmem:[#allocation2 + $0x60] sm:$0xff] %vm585_vm11, %v562_v41 }
 0x213   :  { %807 = vst.msk [vmem:[#allocation2 + $0x20] sm:$0xff] %vm802_vm1, %v769_v16  ;;  %1554 = vmatmul.mubr.msk.f32.gmra.mrb[10].mxu1 %vm920_vm0, %v897_v39  ;;  %813 = vst.msk [vmem:[#allocation2 + $0x58] sm:$0xff] %vm802_vm1, %v781_v40 }
 0x214   :  { %664 = vst.msk [vmem:[#allocation2 + $0x67] sm:$0xfe] %vm650_vm12, %v629_v25  ;;  %v627_v43 = vpop.permute.xlu1 %626  ;;  %v840_v44 = vpop.permute.xlu0 %839 }
 0x215   :  { %681 = vst.msk [vmem:[#allocation2 + $0x6f] sm:$0x1] %vm667_vm13, %v1693_v19  ;;  %680 = vst.msk [vmem:[#allocation2 + $0x67] sm:$0x1] %vm667_vm13, %v1693_v19 }
 0x216   :  { %866 = vst.msk [vmem:[#allocation2 + $0x1f] sm:$0xfe] %vm861_vm2, %v828_v18  ;;  %872 = vst.msk [vmem:[#allocation2 + $0x57] sm:$0xfe] %vm861_vm2, %v840_v44 }
 0x217   :  { %884 = vst.msk [vmem:[#allocation2 + $0x27] sm:$0x1] %vm879_vm5, %v1693_v19  ;;  %890 = vst.msk [vmem:[#allocation2 + $0x5f] sm:$0x1] %vm879_vm5, %v1693_v19 }
 0x218   :  { %758 = vst.msk [vmem:[#allocation2 + $0x68] sm:$0x1] %vm745_vm14, %v1693_v19  ;;  %v697_v45 = vpop.permute.xlu1 %696  ;;  %v470_v46 = vpop.permute.xlu0 %469 }
 0x219   :  { %663 = vst.msk [vmem:[#allocation2 + $0x5f] sm:$0xfe] %vm650_vm12, %v627_v43 }
 0x21a   :  { %738 = vst.msk [vmem:[#allocation2 + $0x61] sm:$0x7f] %vm726_vm15, %v2296_v22  ;;  %v1420_v22 = vld [vmem:[%s2532_s4 + $0x1] ss:$0 sm:$0xff] }
 0x21b   :  { %757 = vst.msk [vmem:[#allocation2 + $0x60] sm:$0x1] %vm745_vm14, %v1693_v19 }
 0x21c   :  { %814 = vst.msk [vmem:[#allocation2 + $0x60] sm:$0xff] %vm802_vm1, %v2298_v24  ;;  %v832_v47 = vpop.permute.xlu1 %831  ;;  %v552_v48 = vpop.permute.xlu0 %551 }
 0x21d   :  { %873 = vst.msk [vmem:[#allocation2 + $0x5f] sm:$0xfe] %vm861_vm2, %v2306_v26 }
 0x21e   :  { %v898_v42 = vld [vmem:[#allocation2 + $0x20] sm:$0xff]  ;;  %891 = vst.msk [vmem:[#allocation2 + $0x67] sm:$0x1] %vm879_vm5, %v1693_v19  ;;  %v905_v16 = vld [vmem:[#allocation2 + $0x58] sm:$0xff] }
 0x21f   :  { %1556 = vmatprep.mubr.msk.f32.mxu1 %vm920_vm0, %v898_v42 }
 0x220   :  { %v486_v49 = vpop.permute.xlu1 %485  ;;  %v617_v50 = vpop.permute.xlu0 %616 }
 0x224   :  { %v568_v51 = vpop.permute.xlu1 %567  ;;  %v773_v52 = vpop.permute.xlu0 %772 }
 0x225   :  { %v906_v17 = vld [vmem:[#allocation2 + $0x60] sm:$0xff] }
 0x228   :  { %v468_v54 = vpop.permute.xlu1 %467  ;;  %v332_v55 = vpop.permute.xlu0 %331 }
 0x229   :  { %510 = vst.msk [vmem:[#allocation2 + $0x31] sm:$0x7f] %vm503_vm10, %v468_v54 }
 0x22a   :  { %368 = vst.msk [vmem:[#allocation2 + $0x38] sm:$0xff] %vm361_vm4, %v332_v55 }
 0x22b   :  { %445 = vst.msk [vmem:[#allocation2 + $0x3f] sm:$0x1] %vm438_vm8, %v1693_v19 }
 0x22c   :  { %v550_v56 = vpop.permute.xlu1 %549  ;;  %v391_v57 = vpop.permute.xlu0 %390 }
 0x22d   :  { %592 = vst.msk [vmem:[#allocation2 + $0x30] sm:$0xff] %vm585_vm11, %v550_v56 }
 0x22e   :  { %427 = vst.msk [vmem:[#allocation2 + $0x37] sm:$0xfe] %vm420_vm9, %v391_v57 }
 0x22f   :  { %674 = vst.msk [vmem:[#allocation2 + $0x37] sm:$0x1] %vm667_vm13, %v1693_v19 }
 0x230   :  { %511 = vst.msk [vmem:[#allocation2 + $0x39] sm:$0x7f] %vm503_vm10, %v470_v46  ;;  %v615_v58 = vpop.permute.xlu1 %614  ;;  %v695_v59 = vpop.permute.xlu0 %694 }
 0x231   :  { %528 = vst.msk [vmem:[#allocation2 + $0x38] sm:$0x1] %vm520_vm6, %v1693_v19 }
 0x232   :  { %593 = vst.msk [vmem:[#allocation2 + $0x38] sm:$0xff] %vm585_vm11, %v552_v48 }
 0x233   :  { %658 = vst.msk [vmem:[#allocation2 + $0x37] sm:$0xfe] %vm650_vm12, %v617_v50  ;;  %657 = vst.msk [vmem:[#allocation2 + $0x2f] sm:$0xfe] %vm650_vm12, %v615_v58 }
 0x234   :  { %675 = vst.msk [vmem:[#allocation2 + $0x3f] sm:$0x1] %vm667_vm13, %v1693_v19  ;;  %v711_v60 = vpop.permute.xlu1 %710  ;;  %v771_v62 = vpop.permute.xlu0 %770 }
 0x235   :  { %732 = vst.msk [vmem:[#allocation2 + $0x29] sm:$0x7f] %vm726_vm15, %v695_v59  ;;  %733 = vst.msk [vmem:[#allocation2 + $0x31] sm:$0x7f] %vm726_vm15, %v697_v45 }
 0x236   :  { %743 = vst.msk [vmem:[#allocation2 + $0x38] sm:$0xff] %vm742_vm7, %v1693_v19 }
 0x237   :  { %752 = vst.msk [vmem:[#allocation2 + $0x30] sm:$0x1] %vm745_vm14, %v1693_v19 }
 0x238   :  { %817 = vst.msk [vmem:[#allocation2 + $0x38] sm:$0xff] %vm802_vm1, %v1693_v19  ;;  %809 = vst.msk [vmem:[#allocation2 + $0x30] sm:$0xff] %vm802_vm1, %v773_v52  ;;  %v346_v63 = vpop.permute.xlu1 %345  ;;  %v830_v0 = vpop.permute.xlu0 %829 }
 0x239   :  { %877 = vst.msk [vmem:[#allocation2 + $0x38] sm:$0xff] %vm876_vm3, %v1693_v19 }
 0x23a   :  { %868 = vst.msk [vmem:[#allocation2 + $0x2f] sm:$0xfe] %vm861_vm2, %v832_v47 }
 0x23b   :  { %886 = vst.msk [vmem:[#allocation2 + $0x37] sm:$0x1] %vm879_vm5, %v1693_v19 }
 0x23c   :  { %808 = vst.msk [vmem:[#allocation2 + $0x28] sm:$0xff] %vm802_vm1, %v771_v62  ;;  %v405_v1 = vpop.permute.xlu1 %404  ;;  %v633_v3 = vpop.permute.xlu0 %632 }
 0x23d   :  { %885 = vst.msk [vmem:[#allocation2 + $0x2f] sm:$0x1] %vm879_vm5, %v1693_v19 }
 0x23e   :  { %375 = vst.msk [vmem:[#allocation2 + $0x78] sm:$0xff] %vm361_vm4, %v346_v63 }
 0x23f   :  { %867 = vst.msk [vmem:[#allocation2 + $0x27] sm:$0xfe] %vm861_vm2, %v830_v0 }
 0x240   :  { %452 = vst.msk [vmem:[#allocation2 + $0x7f] sm:$0x1] %vm438_vm8, %v1693_v19  ;;  %v709_v61 = vpop.permute.xlu1 %708  ;;  %v484_v4 = vpop.permute.xlu0 %483  ;;  %v901_v7 = vld [vmem:[#allocation2 + $0x38] sm:$0xff] }
 0x241   :  { %434 = vst.msk [vmem:[#allocation2 + $0x77] sm:$0xfe] %vm420_vm9, %v405_v1 }
 0x242   :  { %519 = vst.msk [vmem:[#allocation2 + $0x79] sm:$0x7f] %vm503_vm10, %v486_v49  ;;  %518 = vst.msk [vmem:[#allocation2 + $0x71] sm:$0x7f] %vm503_vm10, %v484_v4  ;;  %v900_v6 = vld [vmem:[#allocation2 + $0x30] sm:$0xff] }
 0x243   :  { %536 = vst.msk [vmem:[#allocation2 + $0x78] sm:$0x1] %vm520_vm6, %v1693_v19 }
 0x244   :  { %601 = vst.msk [vmem:[#allocation2 + $0x78] sm:$0xff] %vm585_vm11, %v568_v51  ;;  %v785_v8 = vpop.permute.xlu1 %784  ;;  %v566_v9 = vpop.permute.xlu0 %565 }
 0x245   :  { %683 = vst.msk [vmem:[#allocation2 + $0x7f] sm:$0x1] %vm667_vm13, %v1693_v19 }
 0x246   :  { %666 = vst.msk [vmem:[#allocation2 + $0x77] sm:$0xfe] %vm650_vm12, %v633_v3  ;;  %v899_v5 = vld [vmem:[#allocation2 + $0x28] sm:$0xff] }
 0x247   :  { %744 = vst.msk [vmem:[#allocation2 + $0x78] sm:$0xff] %vm742_vm7, %v1693_v19  ;;  %1557 = vmatmul.mubr.msk.f32.gmra.mrb[12].mxu1 %vm920_vm0, %v899_v5 }
 0x248   :  { %739 = vst.msk [vmem:[#allocation2 + $0x69] sm:$0x7f] %vm726_vm15, %v709_v61  ;;  %1559 = vmatprep.mubr.msk.f32.mxu1 %vm920_vm0, %v900_v6  ;;  %v844_v11 = vpop.permute.xlu1 %843  ;;  %v631_v12 = vpop.permute.xlu0 %630 }
 0x249   :  { %818 = vst.msk [vmem:[#allocation2 + $0x78] sm:$0xff] %vm802_vm1, %v1693_v19  ;;  %815 = vst.msk [vmem:[#allocation2 + $0x68] sm:$0xff] %vm802_vm1, %v785_v8 }
 0x24a   :  { %878 = vst.msk [vmem:[#allocation2 + $0x78] sm:$0xff] %vm876_vm3, %v1693_v19  ;;  %vm2537_vm3 = vcmask 31744  }
 0x24b   :  { %600 = vst.msk [vmem:[#allocation2 + $0x70] sm:$0xff] %vm585_vm11, %v566_v9  ;;  %1560 = vmatmul.mubr.msk.f32.gmra.mrb[14].mxu1 %vm920_vm0, %v901_v7  ;;  %vm2538_vm4 = vmmov %vm2537_vm3  ;;  %v2479_v7 = vld [vmem:[%s2533_s5] ss:$0 sm:$0xff]  ;;  %s1701_s5 = smov [#allocation6]  }
 0x24c   :  { %892 = vst.msk [vmem:[#allocation2 + $0x6f] sm:$0x1] %vm879_vm5, %v1693_v19  ;;  %1562 = vmatprep.mubr.msk.f32.mxu1 %vm920_vm0, %v902_v10  ;;  %v846_v2 = vpop.permute.xlu1 %845  ;;  %v787_v15 = vpop.permute.xlu0 %786  ;;  %s1391_s13 = sshll.u32 %s1701_s5, 4  ;;  %s1392_s13 = int_to_ptr.vmem [resolvable:$true] %s1391_s13 }
 0x24d   :  { %682 = vst.msk [vmem:[#allocation2 + $0x77] sm:$0x1] %vm667_vm13, %v1693_v19  ;;  %s1664_s14 = scalar_lea.vmem %s1392_s13, 2048  ;;  %p1669_p9 = scmp.lt.s32.totalorder %s1392_s13, %s1392_s13 }
 0x24e   :  { %874 = vst.msk [vmem:[#allocation2 + $0x67] sm:$0xfe] %vm861_vm2, %v844_v11  ;;  %p1665_p8 = scmp.ne.s32.totalorder %s1392_s13, %s1664_s14  ;;  %p1670_p10 = scmp.lt.s32.totalorder %s1664_s14, %s1664_s14 }
 0x24f   :  { %665 = vst.msk [vmem:[#allocation2 + $0x6f] sm:$0xfe] %vm650_vm12, %v631_v12  ;;  %1563 = vmatmul.mubr.msk.f32.gmra.mrb[16].mxu1 %vm920_vm0, %v903_v13  ;;  %v1626_v12 = vld [vmem:[#allocation3 + $0x8] sm:$0xff] }
 0x250   :  { %740 = vst.msk [vmem:[#allocation2 + $0x71] sm:$0x7f] %vm726_vm15, %v711_v60  ;;  %1565 = vmatprep.mubr.msk.f32.mxu1 %vm920_vm0, %v904_v14  ;;  %v1627_v14 = vld [vmem:[#allocation3] sm:$0xff]  ;;  %p1671_p11 = por %p1670_p10, %p1669_p9 }
 0x251   :  { %759 = vst.msk [vmem:[#allocation2 + $0x70] sm:$0x1] %vm745_vm14, %v1693_v19  ;;  %v909_v20 = vld [vmem:[#allocation2 + $0x78] sm:$0xff] }
 0x252   :  { %816 = vst.msk [vmem:[#allocation2 + $0x70] sm:$0xff] %vm802_vm1, %v787_v15  ;;  %p1672_p12 = pnand %p1671_p11, %p1665_p8 }
 0x253   :  { %1566 = vmatmul.mubr.msk.f32.gmra.mrb[18].mxu1 %vm920_vm0, %v905_v16  ;;  %875 = vst.msk [vmem:[#allocation2 + $0x6f] sm:$0xfe] %vm861_vm2, %v846_v2 }
 0x254   :  { %893 = vst.msk [vmem:[#allocation2 + $0x77] sm:$0x1] %vm879_vm5, %v1693_v19  ;;  %1568 = vmatprep.mubr.msk.f32.mxu1 %vm920_vm0, %v906_v17 }
 0x255   :  { %v907_v18 = vld [vmem:[#allocation2 + $0x68] sm:$0xff] }
 0x257   :  { %1569 = vmatmul.mubr.msk.f32.gmra.mrb[20].mxu1 %vm920_vm0, %v907_v18 }
 0x25b   :  { %v908_v21 = vld [vmem:[#allocation2 + $0x70] sm:$0xff] }
 0x25c   :  { %1571 = vmatprep.mubr.msk.f32.mxu1 %vm920_vm0, %v908_v21 }
 0x25d   :  { %1572 = vmatmul.mubr.msk.f32.gmra.mrb[22].mxu1 %vm920_vm0, %v909_v20  ;;  %vm2539_vm0 = vmmov %vm2537_vm3 }
 0x25e   :  { %vm2540_vm6 = vmmov %vm2539_vm0 }
 0x25f   :  { %vm2541_vm8 = vmmov %vm2539_vm0 }
 0x260   :  { %vm2542_vm9 = vmmov %vm2539_vm0 }
 0x261   :  { %vm2543_vm10 = vmmov %vm2539_vm0 }
 0x262   :  { %vm2544_vm11 = vmmov %vm2539_vm0 }
 0x263   :  { %vm2545_vm12 = vmmov %vm2539_vm0 }
 0x264   :  { %vm2546_vm13 = vmmov %vm2539_vm0 }
 0x265   :  { %vm2547_vm14 = vmmov %vm2539_vm0 }
 0x266   :  { %vm2548_vm15 = vmmov %vm2539_vm0 }
 0x267   :  { %vm2549_vm1 = vmmov %vm2539_vm0 }
 0x268   :  { %vm2550_vm2 = vmmov %vm2539_vm0 }
 0x269   :  { %vm2551_vm5 = vmmov %vm2539_vm0 }
 0x26a   :  { %vm2552_vm7 = vmmov %vm2539_vm0 }
 0x2a6   :  { %v1552_v23 = vpop.f32.mrb[8].mxu1 }
 0x2a7   :  { %v1045_v24 = vadd.f32 %v1552_v23, %v1420_v22  ;;  %v1039_v25 = vpop.f32.mrb[9].mxu1 }
 0x2a8   :  { %v1040_v26 = vadd.f32 %v1420_v22, %v1039_v25 }
 0x2a9   :  { %v1119_v27 = vmax.f32 %v1045_v24, 0.0  ;;  %v1629_v24 = vld [vmem:[#allocation3 + $0x10] sm:$0xff] }
 0x2aa   :  { %v1118_v19 = vmax.f32 %v1040_v26, 0.0 }
 0x2ac   :  { %1576 = vmatprep.mubr.msk.f32.mxu0 %vm2537_vm3, %v1118_v19  ;;  %vm2553_vm3 = vcmask 130048  }
 0x2ad   :  { %1577 = vmatmul.mubr.msk.f32.vlgmr.msra.gmra.mrb[8].mxu0 %vm2538_vm4, %v1119_v27  ;;  %vm2554_vm4 = vmmov %vm2553_vm3 }
 0x2e6   :  { %v1555_v28 = vpop.f32.mrb[10].mxu1 }
 0x2e7   :  { %v1055_v29 = vadd.f32 %v1555_v28, %v1420_v22  ;;  %v1049_v30 = vpop.f32.mrb[11].mxu1 }
 0x2e8   :  { %v1050_v31 = vadd.f32 %v1420_v22, %v1049_v30 }
 0x2e9   :  { %v1121_v33 = vmax.f32 %v1055_v29, 0.0 }
 0x2ea   :  { %v1120_v32 = vmax.f32 %v1050_v31, 0.0  ;;  %v1630_v31 = vld [vmem:[#allocation3 + $0x28] sm:$0xff] }
 0x2ec   :  { %1579 = vmatprep.mubr.msk.f32.mxu0 %vm2539_vm0, %v1120_v32  ;;  %vm2555_vm0 = vmmov %vm2553_vm3 }
 0x2ed   :  { %1580 = vmatmul.mubr.msk.f32.gmra.mrb[10].mxu0 %vm2540_vm6, %v1121_v33  ;;  %vm2556_vm6 = vmmov %vm2555_vm0  ;;  %v1631_v33 = vld [vmem:[#allocation3 + $0x20] sm:$0xff] }
 0x31a   :  { %v1558_v34 = vpop.f32.mrb[12].mxu1 }
 0x31b   :  { %v1065_v35 = vadd.f32 %v1558_v34, %v1420_v22  ;;  %v1059_v36 = vpop.f32.mrb[13].mxu1 }
 0x31c   :  { %v1060_v37 = vadd.f32 %v1420_v22, %v1059_v36 }
 0x31d   :  { %v1123_v40 = vmax.f32 %v1065_v35, 0.0 }
 0x31e   :  { %v1122_v38 = vmax.f32 %v1060_v37, 0.0  ;;  %v1561_v39 = vpop.f32.mrb[14].mxu1 }
 0x31f   :  { %v1075_v41 = vadd.f32 %v1561_v39, %v1420_v22  ;;  %v1069_v42 = vpop.f32.mrb[15].mxu1 }
 0x320   :  { %v1070_v43 = vadd.f32 %v1420_v22, %v1069_v42  ;;  %1582 = vmatprep.mubr.msk.f32.mxu0 %vm2541_vm8, %v1122_v38  ;;  %vm2557_vm8 = vmmov %vm2555_vm0 }
 0x321   :  { %v1125_v44 = vmax.f32 %v1075_v41, 0.0  ;;  %1583 = vmatmul.mubr.msk.f32.gmra.mrb[12].mxu0 %vm2542_vm9, %v1123_v40  ;;  %v1632_v41 = vld [vmem:[#allocation3 + $0x38] sm:$0xff]  ;;  %vm2558_vm9 = vmmov %vm2555_vm0 }
 0x322   :  { %v1124_v45 = vmax.f32 %v1070_v43, 0.0  ;;  %v1564_v46 = vpop.f32.mrb[16].mxu1  ;;  %v1633_v43 = vld [vmem:[#allocation3 + $0x30] sm:$0xff] }
 0x323   :  { %v1085_v47 = vadd.f32 %v1564_v46, %v1420_v22  ;;  %v1079_v48 = vpop.f32.mrb[17].mxu1 }
 0x324   :  { %v1080_v49 = vadd.f32 %v1420_v22, %v1079_v48  ;;  %1585 = vmatprep.mubr.msk.f32.mxu0 %vm2543_vm10, %v1124_v45  ;;  %vm2559_vm10 = vmmov %vm2555_vm0 }
 0x325   :  { %1586 = vmatmul.mubr.msk.f32.gmra.mrb[14].mxu0 %vm2544_vm11, %v1125_v44  ;;  %v1127_v52 = vmax.f32 %v1085_v47, 0.0  ;;  %vm2560_vm11 = vmmov %vm2555_vm0 }
 0x326   :  { %v1126_v50 = vmax.f32 %v1080_v49, 0.0  ;;  %v1567_v51 = vpop.f32.mrb[18].mxu1 }
 0x327   :  { %v1095_v53 = vadd.f32 %v1567_v51, %v1420_v22  ;;  %v1089_v54 = vpop.f32.mrb[19].mxu1  ;;  %v1634_v51 = vld [vmem:[#allocation3 + $0x48] sm:$0xff] }
 0x328   :  { %v1090_v55 = vadd.f32 %v1420_v22, %v1089_v54  ;;  %1588 = vmatprep.mubr.msk.f32.mxu0 %vm2545_vm12, %v1126_v50  ;;  %vm2561_vm12 = vmmov %vm2555_vm0 }
 0x329   :  { %1589 = vmatmul.mubr.msk.f32.gmra.mrb[16].mxu0 %vm2546_vm13, %v1127_v52  ;;  %v1129_v58 = vmax.f32 %v1095_v53, 0.0  ;;  %v1635_v53 = vld [vmem:[#allocation3 + $0x40] sm:$0xff]  ;;  %vm2562_vm13 = vmmov %vm2555_vm0 }
 0x32a   :  { %v1128_v56 = vmax.f32 %v1090_v55, 0.0  ;;  %v1570_v57 = vpop.f32.mrb[20].mxu1 }
 0x32b   :  { %v1105_v59 = vadd.f32 %v1570_v57, %v1420_v22  ;;  %v1099_v60 = vpop.f32.mrb[21].mxu1 }
 0x32c   :  { %v1100_v62 = vadd.f32 %v1420_v22, %v1099_v60  ;;  %1591 = vmatprep.mubr.msk.f32.mxu0 %vm2547_vm14, %v1128_v56  ;;  %vm2563_vm14 = vmmov %vm2555_vm0 }
 0x32d   :  { %1592 = vmatmul.mubr.msk.f32.gmra.mrb[18].mxu0 %vm2548_vm15, %v1129_v58  ;;  %v1131_v0 = vmax.f32 %v1105_v59, 0.0  ;;  %vm2564_vm15 = vmmov %vm2555_vm0 }
 0x32e   :  { %v1130_v63 = vmax.f32 %v1100_v62, 0.0  ;;  %v1636_v62 = vld [vmem:[#allocation3 + $0x58] sm:$0xff] }
 0x330   :  { %v1573_v1 = vpop.f32.mrb[22].mxu1  ;;  %1594 = vmatprep.mubr.msk.f32.mxu0 %vm2549_vm1, %v1130_v63  ;;  %vm2565_vm1 = vmmov %vm2555_vm0 }
 0x331   :  { %v1115_v3 = vadd.f32 %v1573_v1, %v1420_v22  ;;  %v1109_v61 = vpop.f32.mrb[23].mxu1  ;;  %1595 = vmatmul.mubr.msk.f32.gmra.mrb[20].mxu0 %vm2550_vm2, %v1131_v0  ;;  %v1637_v0 = vld [vmem:[#allocation3 + $0x50] sm:$0xff]  ;;  %vm2566_vm2 = vmmov %vm2555_vm0 }
 0x332   :  { %v1110_v4 = vadd.f32 %v1420_v22, %v1109_v61  ;;  %v1628_v22 = vld [vmem:[#allocation3 + $0x18] sm:$0xff] }
 0x333   :  { %v1133_v6 = vmax.f32 %v1115_v3, 0.0 }
 0x334   :  { %v1132_v5 = vmax.f32 %v1110_v4, 0.0 }
 0x336   :  { %1597 = vmatprep.mubr.msk.f32.mxu0 %vm2551_vm5, %v1132_v5  ;;  %vm2567_vm5 = vmmov %vm2555_vm0 }
 0x337   :  { %1598 = vmatmul.mubr.msk.f32.gmra.mrb[22].mxu0 %vm2552_vm7, %v1133_v6  ;;  %vm2568_vm7 = vmmov %vm2555_vm0 }
 0x380   :  { %v1578_v8 = vpop.f32.mrb[8].mxu0 }
 0x381   :  { %v1265_v9 = vadd.f32 %v1578_v8, %v2479_v7  ;;  %v1259_v10 = vpop.f32.mrb[9].mxu0 }
 0x382   :  { %v1260_v11 = vadd.f32 %v2479_v7, %v1259_v10 }
 0x383   :  { %v1339_v13 = vadd.f32 %v1626_v12, %v1265_v9  ;;  %v1638_v9 = vld [vmem:[#allocation3 + $0x68] sm:$0xff] }
 0x384   :  { %v1338_v2 = vadd.f32 %v1627_v14, %v1260_v11  ;;  %v1639_v11 = vld [vmem:[#allocation3 + $0x60] sm:$0xff] }
 0x385   :  { %v1355_v15 = vmax.f32 %v1339_v13, 0.0 }
 0x386   :  { %v1354_v16 = vmax.f32 %v1338_v2, 0.0 }
 0x387   :  { %1371 = vst.msk [vmem:[#allocation6 + $0x8] sm:$0xff] %vm2553_vm3, %v1355_v15 }
 0x388   :  { %1370 = vst.msk [vmem:[#allocation6] sm:$0xff] %vm2554_vm4, %v1354_v16 }
 0x3c0   :  { %v1581_v17 = vpop.f32.mrb[10].mxu0 }
 0x3c1   :  { %v1275_v18 = vadd.f32 %v1581_v17, %v2479_v7  ;;  %v1269_v20 = vpop.f32.mrb[11].mxu0 }
 0x3c2   :  { %v1270_v21 = vadd.f32 %v2479_v7, %v1269_v20 }
 0x3c3   :  { %v1341_v23 = vadd.f32 %v1628_v22, %v1275_v18  ;;  %v1640_v18 = vld [vmem:[#allocation3 + $0x78] sm:$0xff] }
 0x3c4   :  { %v1340_v25 = vadd.f32 %v1629_v24, %v1270_v21  ;;  %v1641_v21 = vld [vmem:[#allocation3 + $0x70] sm:$0xff] }
 0x3c5   :  { %v1357_v26 = vmax.f32 %v1341_v23, 0.0 }
 0x3c6   :  { %v1356_v19 = vmax.f32 %v1340_v25, 0.0 }
 0x3c7   :  { %1373 = vst.msk [vmem:[#allocation6 + $0x18] sm:$0xff] %vm2555_vm0, %v1357_v26 }
 0x3c8   :  { %1372 = vst.msk [vmem:[#allocation6 + $0x10] sm:$0xff] %vm2556_vm6, %v1356_v19 }
 0x3f4   :  { %v1584_v27 = vpop.f32.mrb[12].mxu0 }
 0x3f5   :  { %v1285_v28 = vadd.f32 %v1584_v27, %v2479_v7  ;;  %v1279_v29 = vpop.f32.mrb[13].mxu0 }
 0x3f6   :  { %v1280_v30 = vadd.f32 %v2479_v7, %v1279_v29 }
 0x3f7   :  { %v1343_v32 = vadd.f32 %v1630_v31, %v1285_v28 }
 0x3f8   :  { %v1342_v34 = vadd.f32 %v1631_v33, %v1280_v30  ;;  %v1587_v35 = vpop.f32.mrb[14].mxu0 }
 0x3f9   :  { %v1359_v36 = vmax.f32 %v1343_v32, 0.0  ;;  %v1295_v37 = vadd.f32 %v1587_v35, %v2479_v7  ;;  %v1289_v38 = vpop.f32.mrb[15].mxu0 }
 0x3fa   :  { %v1358_v39 = vmax.f32 %v1342_v34, 0.0  ;;  %v1290_v40 = vadd.f32 %v2479_v7, %v1289_v38 }
 0x3fb   :  { %1375 = vst.msk [vmem:[#allocation6 + $0x28] sm:$0xff] %vm2557_vm8, %v1359_v36  ;;  %v1345_v42 = vadd.f32 %v1632_v41, %v1295_v37 }
 0x3fc   :  { %1374 = vst.msk [vmem:[#allocation6 + $0x20] sm:$0xff] %vm2558_vm9, %v1358_v39  ;;  %v1344_v44 = vadd.f32 %v1633_v43, %v1290_v40  ;;  %v1590_v45 = vpop.f32.mrb[16].mxu0 }
 0x3fd   :  { %v1361_v46 = vmax.f32 %v1345_v42, 0.0  ;;  %v1305_v47 = vadd.f32 %v1590_v45, %v2479_v7  ;;  %v1299_v48 = vpop.f32.mrb[17].mxu0 }
 0x3fe   :  { %v1360_v49 = vmax.f32 %v1344_v44, 0.0  ;;  %v1300_v50 = vadd.f32 %v2479_v7, %v1299_v48 }
 0x3ff   :  { %1377 = vst.msk [vmem:[#allocation6 + $0x38] sm:$0xff] %vm2559_vm10, %v1361_v46  ;;  %v1347_v52 = vadd.f32 %v1634_v51, %v1305_v47 }
 0x400   :  { %1376 = vst.msk [vmem:[#allocation6 + $0x30] sm:$0xff] %vm2560_vm11, %v1360_v49  ;;  %v1346_v54 = vadd.f32 %v1635_v53, %v1300_v50  ;;  %v1593_v55 = vpop.f32.mrb[18].mxu0 }
 0x401   :  { %v1363_v56 = vmax.f32 %v1347_v52, 0.0  ;;  %v1315_v57 = vadd.f32 %v1593_v55, %v2479_v7  ;;  %v1309_v58 = vpop.f32.mrb[19].mxu0 }
 0x402   :  { %v1362_v59 = vmax.f32 %v1346_v54, 0.0  ;;  %v1310_v60 = vadd.f32 %v2479_v7, %v1309_v58 }
 0x403   :  { %1379 = vst.msk [vmem:[#allocation6 + $0x48] sm:$0xff] %vm2561_vm12, %v1363_v56  ;;  %v1349_v63 = vadd.f32 %v1636_v62, %v1315_v57 }
 0x404   :  { %1378 = vst.msk [vmem:[#allocation6 + $0x40] sm:$0xff] %vm2562_vm13, %v1362_v59  ;;  %v1348_v1 = vadd.f32 %v1637_v0, %v1310_v60  ;;  %v1596_v3 = vpop.f32.mrb[20].mxu0 }
 0x405   :  { %v1365_v61 = vmax.f32 %v1349_v63, 0.0  ;;  %v1325_v4 = vadd.f32 %v1596_v3, %v2479_v7  ;;  %v1319_v5 = vpop.f32.mrb[21].mxu0 }
 0x406   :  { %v1364_v6 = vmax.f32 %v1348_v1, 0.0  ;;  %v1320_v8 = vadd.f32 %v2479_v7, %v1319_v5 }
 0x407   :  { %1381 = vst.msk [vmem:[#allocation6 + $0x58] sm:$0xff] %vm2563_vm14, %v1365_v61  ;;  %v1351_v10 = vadd.f32 %v1638_v9, %v1325_v4 }
 0x408   :  { %1380 = vst.msk [vmem:[#allocation6 + $0x50] sm:$0xff] %vm2564_vm15, %v1364_v6  ;;  %v1350_v12 = vadd.f32 %v1639_v11, %v1320_v8 }
 0x409   :  { %v1367_v13 = vmax.f32 %v1351_v10, 0.0 }
 0x40a   :  { %v1366_v14 = vmax.f32 %v1350_v12, 0.0  ;;  %v1599_v2 = vpop.f32.mrb[22].mxu0 }
 0x40b   :  { %1383 = vst.msk [vmem:[#allocation6 + $0x68] sm:$0xff] %vm2565_vm1, %v1367_v13  ;;  %v1335_v15 = vadd.f32 %v1599_v2, %v2479_v7  ;;  %v1329_v16 = vpop.f32.mrb[23].mxu0 }
 0x40c   :  { %1382 = vst.msk [vmem:[#allocation6 + $0x60] sm:$0xff] %vm2566_vm2, %v1366_v14  ;;  %v1330_v17 = vadd.f32 %v2479_v7, %v1329_v16 }
 0x40d   :  { %v1353_v20 = vadd.f32 %v1640_v18, %v1335_v15 }
 0x40e   :  { %v1352_v22 = vadd.f32 %v1641_v21, %v1330_v17 }
 0x40f   :  { %v1369_v23 = vmax.f32 %v1353_v20, 0.0 }
 0x410   :  { %v1368_v24 = vmax.f32 %v1352_v22, 0.0 }
 0x411   :  { %1385 = vst.msk [vmem:[#allocation6 + $0x78] sm:$0xff] %vm2567_vm5, %v1369_v23 }
 0x412   :  { %1384 = vst.msk [vmem:[#allocation6 + $0x70] sm:$0xff] %vm2568_vm7, %v1368_v24 }
 0x413   :  { %1675 = shalt.err (!%p1672_p12)
}
 0x414   :  { %s1676_s15 = scalar_lea.hbm %s2534_s6, 2048 }
 0x415   :  { %p1677_p13 = scmp.ne.s32.totalorder %s2534_s6, %s1676_s15  ;;  %p1680_p0 = scmp.lt.u32.totalorder %s1676_s15, %s2534_s6 }
 0x417   :  { %p1682_p1 = pnand %p1680_p0, %p1677_p13 }
 0x419   :  { %1685 = shalt.err (!%p1682_p1)
}
 0x41a   :  { %1397 = dma.vmem_to_hbm [thread:$0]  %s1392_s13, 2048, %s2534_s6, [#allocation5], %s1691_s7, %s1691_s7, %s1692_s8  }
 0x41b   :  { %1688 = dma.done.wait [#allocation5], 2048  }
 0x41c   :  { %1689 = vsyncadd [#allocation5], 4294965248 }
 0x41d   :  { %1401 = vsyncpa [#allocation4], 1 }
 0x41e   :  { %1402 = vsyncpa [#allocation5], 1 }

</bundles_post_ra>
